<compile_context>
chip_gen: v5e
topology: v5e:2x2
jax: 0.10.0
libtpu: 0.0.40
codegen_flags: <defaults>
</compile_context>

<pallas_src>
from functools import partial

import jax
import jax.numpy as jnp
from jax.experimental import pallas as pl
from jax.experimental.pallas import tpu as pltpu

EPS = 1e-5  # torch.nn.LayerNorm default


def _layer_norm(x, w, b):
    mu = jnp.mean(x, axis=-1, keepdims=True)
    var = jnp.mean((x - mu) ** 2, axis=-1, keepdims=True)
    return (x - mu) * jax.lax.rsqrt(var + EPS) * w + b


def _vmem_capacity_bytes():
    try:
        return int(pltpu.get_tpu_info().vmem_capacity_bytes)
    except Exception:
        return 64 << 20  # conservative fallback: v7x per-TensorCore VMEM


def _vmem_limit(need_bytes, cap_bytes):
    # ~75% of physical VMEM so the compiler keeps headroom for its own scratch;
    # never request more than the device can back (v7x = 64 MiB, not 128).
    hard_cap = (cap_bytes * 3) // 4
    return int(min(max(need_bytes, 16 << 20), hard_cap))


def _choose_pair_row_tile(R, Cz, H, budget_bytes):
    """Largest row tile TR (divides R; (TR*R) lane-dense for the output store)
    whose double-buffered blocks + f32 intermediates fit the budget."""
    cands = [tr for tr in range(1, R + 1)
             if R % tr == 0 and ((tr * R) % 128 == 0 or tr == R)]
    for tr in sorted(cands, reverse=True):
        z_blk = tr * R * Cz * 4          # f32 input tile
        o_blk = H * tr * R * 2           # bf16 output tile
        interm = 2 * tr * R * Cz * 4 + H * tr * R * 4
        if 2 * (z_blk + o_blk) + interm <= budget_bytes:
            return tr
    return min(cands)


# ----------------------------- Pallas kernels ------------------------------ #

def pair_bias_kernel(z_ref, lnw_ref, lnb_ref, wzt_ref, o_ref):
    # z_ref: (TR, R, Cz) f32   lnw/lnb: (1, Cz) f32
    # wzt_ref: (H, Cz) bf16    o_ref: (H, TR*R) bf16  (lane-dense in the res dim)
    tr, r, cz = z_ref.shape
    z = z_ref[...].astype(jnp.float32).reshape(tr * r, cz)    # merge leading dims
    zn = _layer_norm(z, lnw_ref[...], lnb_ref[...])
    # (H, Cz) x (TR*R, Cz) contracted over Cz -> (H, TR*R): the bias comes out
    # already in permute_final_dims(..., (2,0,1)) order, stored with 128-wide vst.
    b = jax.lax.dot_general(
        wzt_ref[...], zn.astype(jnp.bfloat16),
        dimension_numbers=(((1,), (1,)), ((), ())),
        preferred_element_type=jnp.float32)
    o_ref[...] = b.astype(o_ref.dtype)


def msa_attn_kernel(m_ref, mask_ref, bias_ref, lnw_ref, lnb_ref,
                    wqg_ref, wkv_ref, bg_ref, wo_ref, o_ref,
                    *, num_heads, head_dim):
    # m_ref: (R, C) f32      mask_ref: (1, R) additive f32
    # bias_ref: (H, R, R) bf16  (grid-invariant -> DMA'd once, VMEM resident)
    # wqg_ref: (C, 2*H*Dh) bf16 = [Wq * Dh**-0.5 | Wg]
    # wkv_ref: (C, 2*H*Dh) bf16 = [Wk | Wv]
    # bg_ref: (1, H*Dh) f32     wo_ref: (H*Dh, C) bf16     o_ref: (R, C) f32
    H, Dh = num_heads, head_dim
    total = H * Dh
    R = m_ref.shape[0]

    # Layer norm once: queries, keys and values all come from the same rows.
    mn = _layer_norm(m_ref[...].astype(jnp.float32), lnw_ref[...], lnb_ref[...])
    mn_b = mn.astype(jnp.bfloat16)

    # Two fused wide-N projections keep the MXU output dimension full.
    qg = jnp.dot(mn_b, wqg_ref[...], preferred_element_type=jnp.float32)  # (R, 2*total)
    kv = jnp.dot(mn_b, wkv_ref[...], preferred_element_type=jnp.float32)  # (R, 2*total)

    g = qg[:, total:] + bg_ref[...]                    # (R, total), lane-major

    # Split into heads ONCE (head-major); per-head indexing is then a leading-dim
    # batch index for the batched einsums, not repeated 32-lane sub-slices.
    def _head_major(x):
        return jnp.transpose(x.reshape(R, H, Dh), (1, 0, 2)).astype(jnp.bfloat16)

    qh = _head_major(qg[:, :total])   # (H, R, Dh); Wq was pre-scaled by Dh**-0.5
    kh = _head_major(kv[:, :total])   # (H, R, Dh)
    vh = _head_major(kv[:, total:])   # (H, R, Dh)

    # Batched attention over heads (MXU, f32 accumulation).
    s = jnp.einsum("hqd,hkd->hqk", qh, kh,
                   preferred_element_type=jnp.float32)                    # (H, R, R)
    s = s + mask_ref[...][None] + bias_ref[...].astype(jnp.float32)

    # explicit softmax: exp on the EUP, divide -> approx reciprocal (EUP slot)
    s_max = jnp.max(s, axis=-1, keepdims=True)
    e = jnp.exp(s - s_max)
    inv_l = pl.reciprocal(jnp.sum(e, axis=-1, keepdims=True), approx=True)
    p = (e * inv_l).astype(jnp.bfloat16)                                  # (H, R, R)

    ctx = jnp.einsum("hqk,hkd->hqd", p, vh,
                     preferred_element_type=jnp.float32)                  # (H, R, Dh)
    ctx = jnp.transpose(ctx, (1, 0, 2)).reshape(R, total)                 # merge heads

    gated = jax.nn.sigmoid(g) * ctx
    # Single wide-K (K = H*Dh) output projection instead of H narrow-K matmuls.
    o_ref[...] = jnp.dot(gated.astype(jnp.bfloat16), wo_ref[...],
                         preferred_element_type=jnp.float32)


# ------------------------------ host wrapper ------------------------------- #

def msa_attention_forward(m, z, mask_add, params, *, num_heads, head_dim,
                          z_row_tile=None):
    S, R, C = m.shape
    Cz = z.shape[-1]
    H = num_heads
    total = H * head_dim

    cap = _vmem_capacity_bytes()

    # ---- host-side weight prep: fuse projections, fold q-scale, cast to bf16 ----
    norm = head_dim ** (-0.5)
    w_qg = jnp.concatenate([params["w_q"] * norm, params["w_g"]],
                           axis=-1).astype(jnp.bfloat16)              # (C, 2*total)
    w_kv = jnp.concatenate([params["w_k"], params["w_v"]],
                           axis=-1).astype(jnp.bfloat16)              # (C, 2*total)
    w_o = params["w_o"].astype(jnp.bfloat16)                          # (total, C)
    w_zt = params["w_z"].T.astype(jnp.bfloat16)                       # (H, Cz)

    # ---- pair bias: layer_norm(z) @ Wz, row-tiled with a VMEM-bounded tile ----
    TR = (z_row_tile if z_row_tile is not None
          else _choose_pair_row_tile(R, Cz, H, budget_bytes=cap // 4))
    assert R % TR == 0 and ((TR * R) % 128 == 0 or TR == R), "bad pair-bias tile"

    pb_need = (2 * (TR * R * Cz * 4 + H * TR * R * 2)
               + 2 * TR * R * Cz * 4 + H * TR * R * 4 + (4 << 20))
    bias_flat = pl.pallas_call(
        pair_bias_kernel,
        out_shape=jax.ShapeDtypeStruct((H, R * R), jnp.bfloat16),
        grid=(R // TR,),
        in_specs=[
            pl.BlockSpec((TR, R, Cz), lambda i: (i, 0, 0)),
            pl.BlockSpec((1, Cz), lambda i: (0, 0)),
            pl.BlockSpec((1, Cz), lambda i: (0, 0)),
            pl.BlockSpec((H, Cz), lambda i: (0, 0)),
        ],
        out_specs=pl.BlockSpec((H, TR * R), lambda i: (0, i)),
        compiler_params=pltpu.CompilerParams(
            dimension_semantics=("parallel",),
            vmem_limit_bytes=_vmem_limit(pb_need, cap)),
    )(z, params["ln_z_w"], params["ln_z_b"], w_zt)
    # (H, R*R) -> (H, R, R): free row-major metadata reshape (no transpose,
    # no HBM roundtrip); equals permute_final_dims(linear_z(ln(z)), (2, 0, 1)).
    bias = bias_flat.reshape(H, R, R)

    # ---- main attention kernel: grid over the sequence axis only (TQ == R) ----
    mask3 = mask_add.reshape(S, 1, R).astype(jnp.float32)

    blocks = (R * C * 4 + R * 4 + H * R * R * 2 + 2 * C * 4
              + 2 * (C * 2 * total * 2) + total * 4 + total * C * 2 + R * C * 4)
    interm = (3 * H * R * R * 4 + H * R * R * 2      # scores / exp / bias-f32 / probs
              + 2 * R * 2 * total * 4                # qg, kv (f32)
              + 3 * H * R * head_dim * 2             # qh / kh / vh (bf16)
              + 2 * H * R * head_dim * 4             # ctx + head merge
              + 4 * R * C * 4)                       # mn, gated, output staging
    attn_need = 2 * blocks + interm + (4 << 20)

    # TODO(synk): single-buffer the grid-invariant blocks (bias/weights/ln params)
    # via pipeline_mode=pl.Buffered(1) once verified on all target generations; with
    # the sequence-only grid their block indices are constant so they are only
    # DMA'd once regardless, this only recovers the second pipeline buffer.
    # TODO(synk): for extremely large R where (H, R, R) no longer fits VMEM, add a
    # query-tiled path with a precomputed-KV prologue kernel.
    out = pl.pallas_call(
        partial(msa_attn_kernel, num_heads=H, head_dim=head_dim),
        out_shape=jax.ShapeDtypeStruct((S, R, C), jnp.float32),
        grid=(S,),
        in_specs=[
            pl.BlockSpec((None, R, C), lambda s: (s, 0, 0)),    # m row (q == k == v)
            pl.BlockSpec((None, 1, R), lambda s: (s, 0, 0)),    # additive mask
            pl.BlockSpec((H, R, R), lambda s: (0, 0, 0)),       # pair bias (resident)
            pl.BlockSpec((1, C), lambda s: (0, 0)),             # ln_m weight
            pl.BlockSpec((1, C), lambda s: (0, 0)),             # ln_m bias
            pl.BlockSpec((C, 2 * total), lambda s: (0, 0)),     # [Wq*scale | Wg]
            pl.BlockSpec((C, 2 * total), lambda s: (0, 0)),     # [Wk | Wv]
            pl.BlockSpec((1, total), lambda s: (0, 0)),         # b_g
            pl.BlockSpec((total, C), lambda s: (0, 0)),         # Wo (pre-transposed)
        ],
        out_specs=pl.BlockSpec((None, R, C), lambda s: (s, 0, 0)),
        compiler_params=pltpu.CompilerParams(
            dimension_semantics=("parallel",),          # S shards across TCs on v7x
            vmem_limit_bytes=_vmem_limit(attn_need, cap)),
    )(m, mask3, bias,
      params["ln_m_w"], params["ln_m_b"],
      w_qg, w_kv, params["b_g"], w_o)
    return out


# --------------------------- pure-JAX reference ----------------------------- #

def msa_attention_reference(m, z, mask_add, params, *, num_heads, head_dim):
    S, R, C = m.shape
    H, Dh = num_heads, head_dim
    mn = _layer_norm(m, params["ln_m_w"][0], params["ln_m_b"][0])
    zn = _layer_norm(z, params["ln_z_w"][0], params["ln_z_b"][0])
    bias = jnp.einsum("ijc,ch->hij", zn, params["w_z"])[None]          # (1, H, R, R)

    q = (mn @ params["w_q"]) * (Dh ** -0.5)
    k = mn @ params["w_k"]
    v = mn @ params["w_v"]
    g = mn @ params["w_g"] + params["b_g"][0]

    qh = q.reshape(S, R, H, Dh).transpose(0, 2, 1, 3)
    kh = k.reshape(S, R, H, Dh).transpose(0, 2, 1, 3)
    vh = v.reshape(S, R, H, Dh).transpose(0, 2, 1, 3)
    attn = jnp.einsum("shqd,shkd->shqk", qh, kh)
    attn = attn + mask_add[:, None, None, :] + bias
    attn = jax.nn.softmax(attn, axis=-1)
    o = jnp.einsum("shqk,shkd->shqd", attn, vh)
    o = o.transpose(0, 2, 1, 3).reshape(S, R, H * Dh)
    o = jax.nn.sigmoid(g) * o
    return o @ params["w_o"]


# ---------------------------------- main ------------------------------------ #

if __name__ == "__main__":
    # Small shapes consistent with the module.
    S, R = 4, 16            # n_seq, n_res
    d_in, d_pair = 32, 16
    num_heads, d_hid = 4, 16
    total = num_heads * d_hid

    key = jax.random.PRNGKey(0)
    ks = jax.random.split(key, 12)

    m = jax.random.normal(ks[0], (S, R, d_in), dtype=jnp.float32)
    z = jax.random.normal(ks[1], (R, R, d_pair), dtype=jnp.float32)
    keep = (jax.random.uniform(ks[2], (S, R)) > 0.2).astype(jnp.float32)
    keep = keep.at[:, 0].set(1.0)                 # ensure at least one valid key
    mask_add = (keep - 1.0) * 1e9                 # additive mask, unifold-style

    params = {
        "ln_m_w": 1.0 + 0.1 * jax.random.normal(ks[3], (1, d_in), dtype=jnp.float32),
        "ln_m_b": 0.1 * jax.random.normal(ks[4], (1, d_in), dtype=jnp.float32),
        "ln_z_w": 1.0 + 0.1 * jax.random.normal(ks[5], (1, d_pair), dtype=jnp.float32),
        "ln_z_b": 0.1 * jax.random.normal(ks[6], (1, d_pair), dtype=jnp.float32),
        "w_z": 0.1 * jax.random.normal(ks[7], (d_pair, num_heads), dtype=jnp.float32),
        "w_q": (d_in ** -0.5) * jax.random.normal(ks[8], (d_in, total), dtype=jnp.float32),
        "w_k": (d_in ** -0.5) * jax.random.normal(ks[9], (d_in, total), dtype=jnp.float32),
        "w_v": (d_in ** -0.5) * jax.random.normal(ks[10], (d_in, total), dtype=jnp.float32),
        "w_g": 0.1 * jax.random.normal(ks[11], (d_in, total), dtype=jnp.float32),
        "b_g": jnp.ones((1, total), dtype=jnp.float32),        # 'gating' init: bias = 1
        "w_o": 0.02 * jax.random.normal(jax.random.fold_in(key, 99),
                                        (total, d_in), dtype=jnp.float32),
        # NOTE: linear_o has a bias in __init__ but forward() only uses the weight
        # (bias is exposed via get_output_bias), so it is intentionally omitted here.
    }

    out = msa_attention_forward(m, z, mask_add, params,
                                num_heads=num_heads, head_dim=d_hid)
    out = jax.block_until_ready(out)

    ref = msa_attention_reference(m, z, mask_add, params,
                                  num_heads=num_heads, head_dim=d_hid)
    ref = jax.block_until_ready(ref)

    assert out.shape == (S, R, d_in)
    assert jnp.all(jnp.isfinite(out))
    max_err = float(jnp.max(jnp.abs(out - ref)))
    assert jnp.allclose(out, ref, atol=3e-2, rtol=3e-2), max_err

    print("KERNEL_OK")
</pallas_src>

<mosaic_0001>
module attributes {stable_mosaic.version = 11 : i64} {
  func.func @pair_bias_kernel(%arg0: i32, %arg1: memref<16x16x16xf32, #tpu.memory_space<vmem>>, %arg2: memref<1x16xf32, #tpu.memory_space<vmem>>, %arg3: memref<1x16xf32, #tpu.memory_space<vmem>>, %arg4: memref<4x16xbf16, #tpu.memory_space<vmem>>, %arg5: memref<4x256xbf16, #tpu.memory_space<vmem>>) attributes {dimension_semantics = [#tpu.dimension_semantics<parallel>], iteration_bounds = array<i64: 1>, scalar_prefetch = 0 : i64, scratch_operands = 0 : i64, tpu.core_type = #tpu.core_type<tc>, window_params = [{transform_indices = @transform_0, window_bounds = array<i64: 16, 16, 16>}, {pipeline_mode = #tpu.pipeline_mode<synchronous>, transform_indices = @transform_1, window_bounds = array<i64: 1, 16>}, {pipeline_mode = #tpu.pipeline_mode<synchronous>, transform_indices = @transform_2, window_bounds = array<i64: 1, 16>}, {pipeline_mode = #tpu.pipeline_mode<synchronous>, transform_indices = @transform_3, window_bounds = array<i64: 4, 16>}, {transform_indices = @transform_4, window_bounds = array<i64: 4, 256>}]} {
    %c0 = arith.constant 0 : index
    %c0_0 = arith.constant 0 : index
    %c0_1 = arith.constant 0 : index
    %0 = vector.load %arg1[%c0, %c0_0, %c0_1] : memref<16x16x16xf32, #tpu.memory_space<vmem>>, vector<16x16x16xf32>
    %1 = vector.shape_cast %0 : vector<16x16x16xf32> to vector<256x16xf32>
    %c0_2 = arith.constant 0 : index
    %c0_3 = arith.constant 0 : index
    %2 = vector.load %arg2[%c0_2, %c0_3] : memref<1x16xf32, #tpu.memory_space<vmem>>, vector<1x16xf32>
    %c0_4 = arith.constant 0 : index
    %c0_5 = arith.constant 0 : index
    %3 = vector.load %arg3[%c0_4, %c0_5] : memref<1x16xf32, #tpu.memory_space<vmem>>, vector<1x16xf32>
    %cst = arith.constant dense<0.000000e+00> : vector<256xf32>
    %4 = vector.multi_reduction <add>, %1, %cst [1] : vector<256x16xf32> to vector<256xf32>
    %5 = vector.shape_cast %4 : vector<256xf32> to vector<256x1xf32>
    %cst_6 = arith.constant 1.600000e+01 : f32
    %6 = vector.broadcast %cst_6 : f32 to vector<256x1xf32>
    %7 = arith.divf %5, %6 : vector<256x1xf32>
    %8 = vector.broadcast %7 : vector<256x1xf32> to vector<256x16xf32>
    %9 = arith.subf %1, %8 : vector<256x16xf32>
    %10 = arith.mulf %9, %9 : vector<256x16xf32>
    %cst_7 = arith.constant dense<0.000000e+00> : vector<256xf32>
    %11 = vector.multi_reduction <add>, %10, %cst_7 [1] : vector<256x16xf32> to vector<256xf32>
    %12 = vector.shape_cast %11 : vector<256xf32> to vector<256x1xf32>
    %cst_8 = arith.constant 1.600000e+01 : f32
    %13 = vector.broadcast %cst_8 : f32 to vector<256x1xf32>
    %14 = arith.divf %12, %13 : vector<256x1xf32>
    %15 = vector.broadcast %7 : vector<256x1xf32> to vector<256x16xf32>
    %16 = arith.subf %1, %15 : vector<256x16xf32>
    %cst_9 = arith.constant 9.99999974E-6 : f32
    %17 = vector.broadcast %cst_9 : f32 to vector<256x1xf32>
    %18 = arith.addf %14, %17 : vector<256x1xf32>
    %19 = math.rsqrt %18 : vector<256x1xf32>
    %20 = vector.broadcast %19 : vector<256x1xf32> to vector<256x16xf32>
    %21 = arith.mulf %16, %20 : vector<256x16xf32>
    %22 = vector.broadcast %2 : vector<1x16xf32> to vector<256x16xf32>
    %23 = arith.mulf %21, %22 : vector<256x16xf32>
    %24 = vector.broadcast %3 : vector<1x16xf32> to vector<256x16xf32>
    %25 = arith.addf %23, %24 : vector<256x16xf32>
    %c0_10 = arith.constant 0 : index
    %c0_11 = arith.constant 0 : index
    %26 = vector.load %arg4[%c0_10, %c0_11] : memref<4x16xbf16, #tpu.memory_space<vmem>>, vector<4x16xbf16>
    %27 = arith.truncf %25 : vector<256x16xf32> to vector<256x16xbf16>
    %cst_12 = arith.constant dense<0.000000e+00> : vector<4x256xf32>
    %28 = tpu.matmul %26, %27, %cst_12 {dimension_numbers = #tpu.dot_dimension_numbers<[1], [1], [0], [0], [0, 0, 1, 0], [], []>} : vector<4x16xbf16>, vector<256x16xbf16>, vector<4x256xf32> -> vector<4x256xf32>
    %29 = arith.truncf %28 : vector<4x256xf32> to vector<4x256xbf16>
    %c0_13 = arith.constant 0 : index
    %c0_14 = arith.constant 0 : index
    %30 = vector.load %arg5[%c0_13, %c0_14] : memref<4x256xbf16, #tpu.memory_space<vmem>>, vector<4x256xbf16>
    tpu.vector_store %arg5[%c0_13, %c0_14], %29 {strides = array<i32>} : memref<4x256xbf16, #tpu.memory_space<vmem>>, vector<4x256xbf16>,
    return
  }
  func.func @transform_0(%arg0: i32) -> (i32, i32, i32) {
    %c0_i32 = arith.constant 0 : i32
    %c0_i32_0 = arith.constant 0 : i32
    %c0_i32_1 = arith.constant 0 : i32
    return %arg0, %c0_i32, %c0_i32_0 : i32, i32, i32
  }
  func.func @transform_1(%arg0: i32) -> (i32, i32) {
    %c0_i32 = arith.constant 0 : i32
    %c0_i32_0 = arith.constant 0 : i32
    %c0_i32_1 = arith.constant 0 : i32
    return %c0_i32, %c0_i32_0 : i32, i32
  }
  func.func @transform_2(%arg0: i32) -> (i32, i32) {
    %c0_i32 = arith.constant 0 : i32
    %c0_i32_0 = arith.constant 0 : i32
    %c0_i32_1 = arith.constant 0 : i32
    return %c0_i32, %c0_i32_0 : i32, i32
  }
  func.func @transform_3(%arg0: i32) -> (i32, i32) {
    %c0_i32 = arith.constant 0 : i32
    %c0_i32_0 = arith.constant 0 : i32
    %c0_i32_1 = arith.constant 0 : i32
    return %c0_i32, %c0_i32_0 : i32, i32
  }
  func.func @transform_4(%arg0: i32) -> (i32, i32) {
    %c0_i32 = arith.constant 0 : i32
    %c0_i32_0 = arith.constant 0 : i32
    return %c0_i32, %arg0 : i32, i32
  }
}

</mosaic_0001>

<bundles_post_ra>
// kernel: tpu_custom_call.1
= control target key start
LH: loop header
LB: loop body
LE: loop exit
PB: predicated region body
PF: predicated region fallthrough
CT: control target
= control target key end

     0   :  { %9 = vsyncpa [#allocation3], 0  ;;  %s2573_s0 = inlined_call_operand.hbm [shape: f32[16,16,16], index: 0, kind: input, shape index: {}]   ;;  %s2574_s1 = inlined_call_operand.hbm [shape: f32[1,16], index: 1, kind: input, shape index: {}]   ;;  %s2575_s2 = inlined_call_operand.hbm [shape: f32[1,16], index: 2, kind: input, shape index: {}]   ;;  %s2576_s3 = inlined_call_operand.vmem [shape: bf16[4,16], index: 3, kind: input, shape index: {}]   ;;  %s2577_s4 = inlined_call_operand.hbm [shape: bf16[4,256], index: 4, kind: output, shape index: {}]  }
   0x1   :  { %10 = vsyncpa [#allocation6], 0  ;;  %s30_s17 = sshll.u32 %s2574_s1, 4  ;;  %s31_s17 = int_to_ptr.hbm [resolvable:$true] %s30_s17 }
   0x2   :  { %11 = vsyncpa [#allocation4], 0  ;;  %s1177_s18 = smov [#allocation5]   ;;  %s16_s22 = sshll.u32 %s2573_s0, 4  ;;  %s17_s22 = int_to_ptr.hbm [resolvable:$true] %s16_s22 }
   0x3   :  { %s32_s19 = sshll.u32 %s1177_s18, 4  ;;  %s1178_s23 = smov [#allocation2]   ;;  %s33_s19 = int_to_ptr.vmem [resolvable:$true] %s32_s19 }
   0x4   :  { %35 = dma.hbm_to_vmem [thread:$0]  %s31_s17, 16, %s33_s19, [#allocation6]  }
   0x5   :  { %s18_s24 = sshll.u32 %s1178_s23, 4  ;;  %s1179_s25 = smov 128   ;;  %s19_s24 = int_to_ptr.vmem [resolvable:$true] %s18_s24 }
   0x6   :  { %s1180_s26 = smov 8   ;;  %s41_s1 = sshll.u32 %s2575_s2, 4  ;;  %s42_s1 = int_to_ptr.hbm [resolvable:$true] %s41_s1 }
   0x7   :  { %24 = dma.hbm_to_vmem [thread:$0]  %s17_s22, 4096, %s19_s24, [#allocation3], %s1179_s25, %s1179_s25, %s1180_s26  }
   0x8   :  { %s1181_s29 = smov [#allocation7]  }
   0x9   :  { %s43_s30 = sshll.u32 %s1181_s29, 4  ;;  %s44_s30 = int_to_ptr.vmem [resolvable:$true] %s43_s30 }
   0xa   :  { %46 = dma.hbm_to_vmem [thread:$0]  %s42_s1, 16, %s44_s30, [#allocation6]  }
   0xb   :  { %1171 = dma.done.wait [#allocation3], 4096  }
   0xc   :  { %1172 = vsyncadd [#allocation3], 4294963200 }
   0xd   :  { %1173 = dma.done.wait [#allocation6], 32  }
   0xe   :  { %1174 = vsyncadd [#allocation6], 4294967264  ;;  %vm95_vm0 = vcmask 130048   ;;  %v1218_v0 = vld [vmem:[#allocation2 + $0xf0] sm:$0xff]  ;;  %v1222_v2 = vld [vmem:[#allocation2 + $0x60] sm:$0xff]  ;;  %s1183_s5 = smov [#allocation8]  }
   0xf   :  { %v1220_v1 = vld [vmem:[#allocation2 + $0x70] sm:$0xff]  ;;  %v186_v3 = vsel %vm95_vm0, %v1218_v0, 0.0  ;;  %v132_v5 = vsel %vm95_vm0, %v1222_v2, 0.0  ;;  %v1230_v6 = vld [vmem:[#allocation2 + $0xf8] sm:$0xff]  ;;  %v1234_v8 = vld [vmem:[#allocation2 + $0x68] sm:$0xff]  ;;  %s985_s6 = sshll.u32 %s1183_s5, 4  ;;  %s986_s6 = int_to_ptr.vmem [resolvable:$true] %s985_s6 }
  0x10   :  { %v138_v4 = vsel %vm95_vm0, %v1220_v1, 0.0  ;;  %187 = vadd.xlane.f32.xlu1 %v186_v3  ;;  %133 = vadd.xlane.f32.xlu2 %v132_v5  ;;  %v1232_v7 = vld [vmem:[#allocation2 + $0x78] sm:$0xff]  ;;  %v189_v9 = vsel %vm95_vm0, %v1230_v6, 0.0  ;;  %v135_v11 = vsel %vm95_vm0, %v1234_v8, 0.0  ;;  %v1242_v12 = vld [vmem:[#allocation2 + $0xe8] sm:$0xff]  ;;  %v1244_v13 = vld [vmem:[#allocation2 + $0xe0] sm:$0xff] }
  0x11   :  { %139 = vadd.xlane.f32.xlu0 %v138_v4  ;;  %v141_v10 = vsel %vm95_vm0, %v1232_v7, 0.0  ;;  %v1246_v14 = vld [vmem:[#allocation2 + $0x50] sm:$0xff]  ;;  %v183_v15 = vsel %vm95_vm0, %v1242_v12, 0.0  ;;  %v180_v16 = vsel %vm95_vm0, %v1244_v13, 0.0  ;;  %v1256_v19 = vld [vmem:[#allocation2 + $0x58] sm:$0xff]  ;;  %v1266_v24 = vld [vmem:[#allocation2 + $0x48] sm:$0xff] }
  0x12   :  { %v126_v17 = vsel %vm95_vm0, %v1246_v14, 0.0  ;;  %v1254_v18 = vld [vmem:[#allocation2 + $0xd0] sm:$0xff]  ;;  %v1258_v20 = vld [vmem:[#allocation2 + $0xd8] sm:$0xff]  ;;  %v129_v22 = vsel %vm95_vm0, %v1256_v19, 0.0  ;;  %v1268_v25 = vld [vmem:[#allocation2 + $0x40] sm:$0xff]  ;;  %v123_v27 = vsel %vm95_vm0, %v1266_v24, 0.0 }
  0x13   :  { %v174_v21 = vsel %vm95_vm0, %v1254_v18, 0.0  ;;  %v177_v23 = vsel %vm95_vm0, %v1258_v20, 0.0  ;;  %v1270_v26 = vld [vmem:[#allocation2 + $0xc0] sm:$0xff]  ;;  %v120_v28 = vsel %vm95_vm0, %v1268_v25, 0.0  ;;  %v1278_v30 = vld [vmem:[#allocation2 + $0xc8] sm:$0xff]  ;;  %v1280_v31 = vld [vmem:[#allocation2 + $0x30] sm:$0xff] }
  0x14   :  { %v168_v29 = vsel %vm95_vm0, %v1270_v26, 0.0  ;;  %v1282_v32 = vld [vmem:[#allocation2 + $0x38] sm:$0xff]  ;;  %v171_v33 = vsel %vm95_vm0, %v1278_v30, 0.0  ;;  %v114_v34 = vsel %vm95_vm0, %v1280_v31, 0.0  ;;  %v1290_v36 = vld [vmem:[#allocation2 + $0xb0] sm:$0xff]  ;;  %v1294_v38 = vld [vmem:[#allocation2 + $0x20] sm:$0xff] }
  0x15   :  { %v117_v35 = vsel %vm95_vm0, %v1282_v32, 0.0  ;;  %v1292_v37 = vld [vmem:[#allocation2 + $0xb8] sm:$0xff]  ;;  %v162_v39 = vsel %vm95_vm0, %v1290_v36, 0.0  ;;  %v108_v41 = vsel %vm95_vm0, %v1294_v38, 0.0  ;;  %v1302_v42 = vld [vmem:[#allocation2 + $0xa0] sm:$0xff]  ;;  %v1304_v43 = vld [vmem:[#allocation2 + $0x28] sm:$0xff] }
  0x16   :  { %v165_v40 = vsel %vm95_vm0, %v1292_v37, 0.0  ;;  %v1306_v44 = vld [vmem:[#allocation2 + $0xa8] sm:$0xff]  ;;  %v156_v45 = vsel %vm95_vm0, %v1302_v42, 0.0  ;;  %v111_v46 = vsel %vm95_vm0, %v1304_v43, 0.0  ;;  %v1314_v48 = vld [vmem:[#allocation2 + $0x90] sm:$0xff]  ;;  %v1318_v50 = vld [vmem:[#allocation2 + $0x18] sm:$0xff] }
  0x17   :  { %v159_v47 = vsel %vm95_vm0, %v1306_v44, 0.0  ;;  %v1316_v49 = vld [vmem:[#allocation2 + $0x10] sm:$0xff]  ;;  %v150_v51 = vsel %vm95_vm0, %v1314_v48, 0.0  ;;  %v105_v53 = vsel %vm95_vm0, %v1318_v50, 0.0  ;;  %v1326_v54 = vld [vmem:[#allocation2 + $0x98] sm:$0xff]  ;;  %v1328_v55 = vld [vmem:[#allocation2] sm:$0xff] }
  0x18   :  { %190 = vadd.xlane.f32.xlu1 %v189_v9  ;;  %136 = vadd.xlane.f32.xlu2 %v135_v11  ;;  %v102_v52 = vsel %vm95_vm0, %v1316_v49, 0.0  ;;  %v1330_v56 = vld [vmem:[#allocation2 + $0x80] sm:$0xff]  ;;  %v153_v57 = vsel %vm95_vm0, %v1326_v54, 0.0  ;;  %v96_v58 = vsel %vm95_vm0, %v1328_v55, 0.0  ;;  %v1338_v60 = vld [vmem:[#allocation2 + $0x8] sm:$0xff]  ;;  %v1182_v3 = vmov 16.0  }
  0x19   :  { %142 = vadd.xlane.f32.xlu0 %v141_v10  ;;  %v144_v59 = vsel %vm95_vm0, %v1330_v56, 0.0  ;;  %v1340_v61 = vld [vmem:[#allocation2 + $0x88] sm:$0xff]  ;;  %v99_v62 = vsel %vm95_vm0, %v1338_v60, 0.0  ;;  %1009 = vrcp.f32 %v1182_v3  ;;  %s987_s9 = sshll.u32 %s2577_s4, 4  ;;  %s988_s9 = int_to_ptr.hbm [resolvable:$true] %s987_s9 }
  0x1a   :  { %v147_v63 = vsel %vm95_vm0, %v1340_v61, 0.0 }
  0x1f   :  { %v1010_v4 = vpop.eup %1009 }
  0x20   :  { %184 = vadd.xlane.f32.xlu1 %v183_v15  ;;  %127 = vadd.xlane.f32.xlu2 %v126_v17  ;;  %v193_v5 = vmul.f32 16.0, %v1010_v4  ;;  %vm197_vm1 = vweird.f32 %v1010_v4 }
  0x21   :  { %181 = vadd.xlane.f32.xlu0 %v180_v16 }
  0x22   :  { %v194_v9 = vsub.f32 1.0, %v193_v5 }
  0x24   :  { %v195_v10 = vmul.f32 %v1010_v4, %v194_v9 }
  0x26   :  { %v196_v11 = vadd.f32 %v1010_v4, %v195_v10 }
  0x28   :  { %175 = vadd.xlane.f32.xlu1 %v174_v21  ;;  %178 = vadd.xlane.f32.xlu2 %v177_v23  ;;  %v1346_v15 = vsel %vm197_vm1, %v1010_v4, %v196_v11 }
  0x29   :  { %130 = vadd.xlane.f32.xlu0 %v129_v22 }
  0x30   :  { %124 = vadd.xlane.f32.xlu1 %v123_v27  ;;  %169 = vadd.xlane.f32.xlu2 %v168_v29 }
  0x31   :  { %121 = vadd.xlane.f32.xlu0 %v120_v28 }
  0x38   :  { %115 = vadd.xlane.f32.xlu1 %v114_v34  ;;  %118 = vadd.xlane.f32.xlu2 %v117_v35 }
  0x39   :  { %172 = vadd.xlane.f32.xlu0 %v171_v33 }
  0x40   :  { %166 = vadd.xlane.f32.xlu1 %v165_v40  ;;  %109 = vadd.xlane.f32.xlu2 %v108_v41 }
  0x41   :  { %163 = vadd.xlane.f32.xlu0 %v162_v39 }
  0x48   :  { %157 = vadd.xlane.f32.xlu1 %v156_v45  ;;  %160 = vadd.xlane.f32.xlu2 %v159_v47 }
  0x49   :  { %112 = vadd.xlane.f32.xlu0 %v111_v46 }
  0x50   :  { %103 = vadd.xlane.f32.xlu1 %v102_v52  ;;  %106 = vadd.xlane.f32.xlu2 %v105_v53 }
  0x51   :  { %151 = vadd.xlane.f32.xlu0 %v150_v51 }
  0x58   :  { %154 = vadd.xlane.f32.xlu1 %v153_v57  ;;  %145 = vadd.xlane.f32.xlu2 %v144_v59 }
  0x59   :  { %97 = vadd.xlane.f32.xlu0 %v96_v58 }
  0x60   :  { %100 = vadd.xlane.f32.xlu1 %v99_v62 }
  0x61   :  { %148 = vadd.xlane.f32.xlu0 %v147_v63 }
  0x83   :  { %v188_v16 = vpop.xlane.xlu1 %187  ;;  %v134_v23 = vpop.xlane.xlu2 %133 }
  0x84   :  { %v140_v17 = vpop.xlane.xlu0 %139  ;;  %v229_v21 = vmul.f32 %v1346_v15, %v188_v16  ;;  %v211_v29 = vmul.f32 %v1346_v15, %v134_v23 }
  0x85   :  { %v213_v22 = vmul.f32 %v1346_v15, %v140_v17 }
  0x86   :  { %v1351_v27 = vsub.f32 %v1218_v0, %v229_v21  ;;  %v1362_v35 = vsub.f32 %v1222_v2, %v211_v29 }
  0x87   :  { %v1354_v28 = vsub.f32 %v1220_v1, %v213_v22 }
  0x88   :  { %v293_v33 = vmul.f32 %v1351_v27, %v1351_v27  ;;  %v275_v2 = vmul.f32 %v1362_v35, %v1362_v35 }
  0x89   :  { %v277_v34 = vmul.f32 %v1354_v28, %v1354_v28 }
  0x8a   :  { %v385_v39 = vsel %vm95_vm0, %v293_v33, 0.0  ;;  %v331_v58 = vsel %vm95_vm0, %v275_v2, 0.0 }
  0x8b   :  { %v337_v40 = vsel %vm95_vm0, %v277_v34, 0.0  ;;  %v191_v0 = vpop.xlane.xlu1 %190  ;;  %386 = vadd.xlane.f32.xlu2 %v385_v39  ;;  %v137_v46 = vpop.xlane.xlu2 %136 }
  0x8c   :  { %v143_v41 = vpop.xlane.xlu0 %142  ;;  %338 = vadd.xlane.f32.xlu0 %v337_v40  ;;  %v230_v1 = vmul.f32 %v1346_v15, %v191_v0  ;;  %v212_v52 = vmul.f32 %v1346_v15, %v137_v46 }
  0x8d   :  { %v214_v45 = vmul.f32 %v1346_v15, %v143_v41 }
  0x8e   :  { %v1369_v47 = vsub.f32 %v1230_v6, %v230_v1 }
  0x8f   :  { %v1372_v51 = vsub.f32 %v1232_v7, %v214_v45  ;;  %v1385_v7 = vsub.f32 %v1234_v8, %v212_v52 }
  0x90   :  { %v294_v57 = vmul.f32 %v1369_v47, %v1369_v47 }
  0x91   :  { %v278_v53 = vmul.f32 %v1372_v51, %v1372_v51  ;;  %v276_v8 = vmul.f32 %v1385_v7, %v1385_v7 }
  0x92   :  { %v388_v6 = vsel %vm95_vm0, %v294_v57, 0.0 }
  0x93   :  { %v340_v59 = vsel %vm95_vm0, %v278_v53, 0.0  ;;  %v185_v62 = vpop.xlane.xlu1 %184  ;;  %332 = vadd.xlane.f32.xlu2 %v331_v58  ;;  %v128_v5 = vpop.xlane.xlu2 %127  ;;  %v334_v29 = vsel %vm95_vm0, %v276_v8, 0.0 }
  0x94   :  { %v182_v63 = vpop.xlane.xlu0 %181  ;;  %341 = vadd.xlane.f32.xlu1 %v340_v59  ;;  %v228_v3 = vmul.f32 %v1346_v15, %v185_v62  ;;  %389 = vadd.xlane.f32.xlu0 %v388_v6  ;;  %v209_v11 = vmul.f32 %v1346_v15, %v128_v5 }
  0x95   :  { %v227_v4 = vmul.f32 %v1346_v15, %v182_v63 }
  0x96   :  { %v1390_v9 = vsub.f32 %v1242_v12, %v228_v3  ;;  %v1403_v21 = vsub.f32 %v1246_v14, %v209_v11 }
  0x97   :  { %v1393_v10 = vsub.f32 %v1244_v13, %v227_v4 }
  0x98   :  { %v292_v16 = vmul.f32 %v1390_v9, %v1390_v9  ;;  %v273_v41 = vmul.f32 %v1403_v21, %v1403_v21 }
  0x99   :  { %v291_v17 = vmul.f32 %v1393_v10, %v1393_v10 }
  0x9a   :  { %v382_v12 = vsel %vm95_vm0, %v292_v16, 0.0  ;;  %v325_v2 = vsel %vm95_vm0, %v273_v41, 0.0 }
  0x9b   :  { %v379_v22 = vsel %vm95_vm0, %v291_v17, 0.0  ;;  %v176_v13 = vpop.xlane.xlu1 %175  ;;  %383 = vadd.xlane.f32.xlu2 %v382_v12  ;;  %v179_v39 = vpop.xlane.xlu2 %178 }
  0x9c   :  { %v131_v23 = vpop.xlane.xlu0 %130  ;;  %380 = vadd.xlane.f32.xlu1 %v379_v22  ;;  %v225_v33 = vmul.f32 %v1346_v15, %v176_v13  ;;  %335 = vadd.xlane.f32.xlu0 %v334_v29  ;;  %v226_v0 = vmul.f32 %v1346_v15, %v179_v39 }
  0x9d   :  { %v210_v34 = vmul.f32 %v1346_v15, %v131_v23 }
  0x9e   :  { %v1411_v40 = vsub.f32 %v1254_v18, %v225_v33  ;;  %v1424_v46 = vsub.f32 %v1258_v20, %v226_v0 }
  0x9f   :  { %v1414_v14 = vsub.f32 %v1256_v19, %v210_v34 }
  0xa0   :  { %v289_v45 = vmul.f32 %v1411_v40, %v1411_v40  ;;  %v290_v63 = vmul.f32 %v1424_v46, %v1424_v46 }
  0xa1   :  { %v274_v1 = vmul.f32 %v1414_v14, %v1414_v14 }
  0xa2   :  { %v373_v19 = vsel %vm95_vm0, %v289_v45, 0.0 }
  0xa3   :  { %v328_v18 = vsel %vm95_vm0, %v274_v1, 0.0  ;;  %v125_v52 = vpop.xlane.xlu1 %124  ;;  %v170_v57 = vpop.xlane.xlu2 %169 }
  0xa4   :  { %v122_v53 = vpop.xlane.xlu0 %121  ;;  %329 = vadd.xlane.f32.xlu2 %v328_v18  ;;  %326 = vadd.xlane.f32.xlu1 %v325_v2  ;;  %v208_v58 = vmul.f32 %v1346_v15, %v125_v52  ;;  %v223_v6 = vmul.f32 %v1346_v15, %v170_v57 }
  0xa5   :  { %v207_v59 = vmul.f32 %v1346_v15, %v122_v53  ;;  %374 = vadd.xlane.f32.xlu0 %v373_v19 }
  0xa6   :  { %v1433_v20 = vsub.f32 %v1266_v24, %v208_v58  ;;  %v1445_v5 = vsub.f32 %v1270_v26, %v223_v6  ;;  %v376_v24 = vsel %vm95_vm0, %v290_v63, 0.0 }
  0xa7   :  { %v1436_v62 = vsub.f32 %v1268_v25, %v207_v59 }
  0xa8   :  { %v272_v4 = vmul.f32 %v1433_v20, %v1433_v20  ;;  %v287_v29 = vmul.f32 %v1445_v5, %v1445_v5 }
  0xa9   :  { %v271_v3 = vmul.f32 %v1436_v62, %v1436_v62 }
  0xaa   :  { %v322_v8 = vsel %vm95_vm0, %v272_v4, 0.0  ;;  %v367_v0 = vsel %vm95_vm0, %v287_v29, 0.0 }
  0xab   :  { %v319_v11 = vsel %vm95_vm0, %v271_v3, 0.0  ;;  %v116_v16 = vpop.xlane.xlu1 %115  ;;  %v119_v12 = vpop.xlane.xlu2 %118 }
  0xac   :  { %v173_v25 = vpop.xlane.xlu0 %172  ;;  %320 = vadd.xlane.f32.xlu2 %v319_v11  ;;  %377 = vadd.xlane.f32.xlu1 %v376_v24  ;;  %v205_v22 = vmul.f32 %v1346_v15, %v116_v16  ;;  %v206_v26 = vmul.f32 %v1346_v15, %v119_v12 }
  0xad   :  { %v224_v17 = vmul.f32 %v1346_v15, %v173_v25  ;;  %323 = vadd.xlane.f32.xlu0 %v322_v8 }
  0xae   :  { %v1457_v23 = vsub.f32 %v1280_v31, %v205_v22  ;;  %v1466_v39 = vsub.f32 %v1282_v32, %v206_v26 }
  0xaf   :  { %v1453_v13 = vsub.f32 %v1278_v30, %v224_v17 }
  0xb0   :  { %2594 = vst [vmem:[#allocation12_spill] sm:$0xff] %v1457_v23  ;;  %v269_v34 = vmul.f32 %v1457_v23, %v1457_v23  ;;  %v270_v53 = vmul.f32 %v1466_v39, %v1466_v39 }
  0xb1   :  { %v288_v33 = vmul.f32 %v1453_v13, %v1453_v13  ;;  %2595 = vst [vmem:[#allocation13_spill] sm:$0xff] %v1466_v39 }
  0xb2   :  { %v313_v41 = vsel %vm95_vm0, %v269_v34, 0.0  ;;  %v316_v6 = vsel %vm95_vm0, %v270_v53, 0.0 }
  0xb3   :  { %v370_v30 = vsel %vm95_vm0, %v288_v33, 0.0  ;;  %v167_v1 = vpop.xlane.xlu1 %166  ;;  %v110_v2 = vpop.xlane.xlu2 %109 }
  0xb4   :  { %v164_v31 = vpop.xlane.xlu0 %163  ;;  %371 = vadd.xlane.f32.xlu2 %v370_v30  ;;  %368 = vadd.xlane.f32.xlu1 %v367_v0  ;;  %v222_v18 = vmul.f32 %v1346_v15, %v167_v1  ;;  %v203_v52 = vmul.f32 %v1346_v15, %v110_v2 }
  0xb5   :  { %v221_v45 = vmul.f32 %v1346_v15, %v164_v31  ;;  %314 = vadd.xlane.f32.xlu0 %v313_v41 }
  0xb6   :  { %v1477_v32 = vsub.f32 %v1292_v37, %v222_v18  ;;  %v1487_v59 = vsub.f32 %v1294_v38, %v203_v52 }
  0xb7   :  { %v1474_v19 = vsub.f32 %v1290_v36, %v221_v45 }
  0xb8   :  { %2597 = vst [vmem:[#allocation15_spill] sm:$0xff] %v1477_v32  ;;  %v286_v58 = vmul.f32 %v1477_v32, %v1477_v32  ;;  %v267_v16 = vmul.f32 %v1487_v59, %v1487_v59 }
  0xb9   :  { %2596 = vst [vmem:[#allocation14_spill] sm:$0xff] %v1474_v19  ;;  %v285_v57 = vmul.f32 %v1474_v19, %v1474_v19 }
  0xba   :  { %2598 = vst [vmem:[#allocation16_spill] sm:$0xff] %v1487_v59  ;;  %v364_v37 = vsel %vm95_vm0, %v286_v58, 0.0  ;;  %v307_v26 = vsel %vm95_vm0, %v267_v16, 0.0 }
  0xbb   :  { %v361_v36 = vsel %vm95_vm0, %v285_v57, 0.0  ;;  %v158_v63 = vpop.xlane.xlu1 %157  ;;  %v161_v24 = vpop.xlane.xlu2 %160 }
  0xbc   :  { %v113_v3 = vpop.xlane.xlu0 %112  ;;  %362 = vadd.xlane.f32.xlu2 %v361_v36  ;;  %317 = vadd.xlane.f32.xlu1 %v316_v6  ;;  %v219_v4 = vmul.f32 %v1346_v15, %v158_v63  ;;  %v220_v25 = vmul.f32 %v1346_v15, %v161_v24 }
  0xbd   :  { %v204_v11 = vmul.f32 %v1346_v15, %v113_v3  ;;  %365 = vadd.xlane.f32.xlu0 %v364_v37 }
  0xbe   :  { %v1495_v8 = vsub.f32 %v1302_v42, %v219_v4  ;;  %v1508_v22 = vsub.f32 %v1306_v44, %v220_v25 }
  0xbf   :  { %v1498_v38 = vsub.f32 %v1304_v43, %v204_v11 }
  0xc0   :  { %2599 = vst [vmem:[#allocation17_spill] sm:$0xff] %v1495_v8  ;;  %v283_v12 = vmul.f32 %v1495_v8, %v1495_v8  ;;  %v284_v31 = vmul.f32 %v1508_v22, %v1508_v22  ;;  %v1726_v8 = vld [vmem:[#allocation7] ss:$0 sm:$0xff] }
  0xc1   :  { %2600 = vst [vmem:[#allocation18_spill] sm:$0xff] %v1498_v38  ;;  %v268_v17 = vmul.f32 %v1498_v38, %v1498_v38 }
  0xc2   :  { %2601 = vst [vmem:[#allocation19_spill] sm:$0xff] %v1508_v22  ;;  %v355_v43 = vsel %vm95_vm0, %v283_v12, 0.0 }
  0xc3   :  { %v310_v42 = vsel %vm95_vm0, %v268_v17, 0.0  ;;  %v104_v33 = vpop.xlane.xlu1 %103  ;;  %v107_v34 = vpop.xlane.xlu2 %106 }
  0xc4   :  { %v152_v29 = vpop.xlane.xlu0 %151  ;;  %311 = vadd.xlane.f32.xlu2 %v310_v42  ;;  %308 = vadd.xlane.f32.xlu1 %v307_v26  ;;  %v201_v30 = vmul.f32 %v1346_v15, %v104_v33  ;;  %v202_v0 = vmul.f32 %v1346_v15, %v107_v34 }
  0xc5   :  { %356 = vadd.xlane.f32.xlu0 %v355_v43  ;;  %v217_v41 = vmul.f32 %v1346_v15, %v152_v29 }
  0xc6   :  { %v1517_v44 = vsub.f32 %v1316_v49, %v201_v30  ;;  %v1522_v1 = vsub.f32 %v1318_v50, %v202_v0  ;;  %v358_v49 = vsel %vm95_vm0, %v284_v31, 0.0 }
  0xc7   :  { %v1529_v2 = vsub.f32 %v1314_v48, %v217_v41 }
  0xc8   :  { %2602 = vst [vmem:[#allocation20_spill] sm:$0xff] %v1517_v44  ;;  %v265_v45 = vmul.f32 %v1517_v44, %v1517_v44  ;;  %v266_v18 = vmul.f32 %v1522_v1, %v1522_v1 }
  0xc9   :  { %2603 = vst [vmem:[#allocation21_spill] sm:$0xff] %v1522_v1  ;;  %v281_v3 = vmul.f32 %v1529_v2, %v1529_v2 }
  0xca   :  { %2604 = vst [vmem:[#allocation22_spill] sm:$0xff] %v1529_v2  ;;  %v301_v52 = vsel %vm95_vm0, %v265_v45, 0.0  ;;  %v304_v57 = vsel %vm95_vm0, %v266_v18, 0.0 }
  0xcb   :  { %v155_v53 = vpop.xlane.xlu1 %154  ;;  %v146_v6 = vpop.xlane.xlu2 %145 }
  0xcc   :  { %302 = vadd.xlane.f32.xlu2 %v301_v52  ;;  %359 = vadd.xlane.f32.xlu1 %v358_v49  ;;  %v98_v50 = vpop.xlane.xlu0 %97  ;;  %v218_v58 = vmul.f32 %v1346_v15, %v155_v53  ;;  %v215_v37 = vmul.f32 %v1346_v15, %v146_v6 }
  0xcd   :  { %305 = vadd.xlane.f32.xlu0 %v304_v57  ;;  %v199_v36 = vmul.f32 %v1346_v15, %v98_v50 }
  0xce   :  { %v1538_v48 = vsub.f32 %v1326_v54, %v218_v58  ;;  %v1546_v4 = vsub.f32 %v1330_v56, %v215_v37  ;;  %v349_v54 = vsel %vm95_vm0, %v281_v3, 0.0 }
  0xcf   :  { %v1541_v63 = vsub.f32 %v1328_v55, %v199_v36 }
  0xd0   :  { %2605 = vst [vmem:[#allocation23_spill] sm:$0xff] %v1538_v48  ;;  %v282_v11 = vmul.f32 %v1538_v48, %v1538_v48  ;;  %v279_v42 = vmul.f32 %v1546_v4, %v1546_v4 }
  0xd1   :  { %2606 = vst [vmem:[#allocation24_spill] sm:$0xff] %v1541_v63  ;;  %v263_v24 = vmul.f32 %v1541_v63, %v1541_v63 }
  0xd2   :  { %2607 = vst [vmem:[#allocation25_spill] sm:$0xff] %v1546_v4  ;;  %v352_v25 = vsel %vm95_vm0, %v282_v11, 0.0  ;;  %v343_v29 = vsel %vm95_vm0, %v279_v42, 0.0 }
  0xd3   :  { %v295_v16 = vsel %vm95_vm0, %v263_v24, 0.0  ;;  %v101_v55 = vpop.xlane.xlu1 %100 }
  0xd4   :  { %353 = vadd.xlane.f32.xlu2 %v352_v25  ;;  %350 = vadd.xlane.f32.xlu1 %v349_v54  ;;  %v149_v17 = vpop.xlane.xlu0 %148  ;;  %v200_v12 = vmul.f32 %v1346_v15, %v101_v55 }
  0xd5   :  { %296 = vadd.xlane.f32.xlu0 %v295_v16  ;;  %v216_v56 = vmul.f32 %v1346_v15, %v149_v17 }
  0xd6   :  { %v1560_v26 = vsub.f32 %v1338_v60, %v200_v12 }
  0xd7   :  { %v1563_v43 = vsub.f32 %v1340_v61, %v216_v56 }
  0xd8   :  { %2608 = vst [vmem:[#allocation26_spill] sm:$0xff] %v1560_v26  ;;  %v264_v33 = vmul.f32 %v1560_v26, %v1560_v26 }
  0xd9   :  { %2609 = vst [vmem:[#allocation27_spill] sm:$0xff] %v1563_v43  ;;  %v280_v34 = vmul.f32 %v1563_v43, %v1563_v43 }
  0xda   :  { %v298_v30 = vsel %vm95_vm0, %v264_v33, 0.0 }
  0xdb   :  { %v346_v0 = vsel %vm95_vm0, %v280_v34, 0.0 }
  0xdc   :  { %344 = vadd.xlane.f32.xlu2 %v343_v29  ;;  %299 = vadd.xlane.f32.xlu1 %v298_v30 }
  0xdd   :  { %347 = vadd.xlane.f32.xlu0 %v346_v0 }
  0xfe   :  { %v387_v60 = vpop.xlane.xlu2 %386 }
  0xff   :  { %v339_v41 = vpop.xlane.xlu0 %338  ;;  %v421_v61 = vmul.f32 %v387_v60, %v1346_v15 }
 0x100   :  { %v405_v31 = vmul.f32 %v339_v41, %v1346_v15 }
 0x101   :  { %v1576_v18 = vadd.f32 1e-05, %v421_v61 }
 0x102   :  { %v1574_v45 = vadd.f32 1e-05, %v405_v31 }
 0x103   :  { %vm761_vm5 = vweird.f32 %v1576_v18 }
 0x104   :  { %1011 = vrsqrt.f32 %v1574_v45  ;;  %vm601_vm3 = vweird.f32 %v1574_v45 }
 0x105   :  { %1013 = vrsqrt.f32 %v1576_v18 }
 0x106   :  { %v333_v52 = vpop.xlane.xlu2 %332 }
 0x107   :  { %v342_v49 = vpop.xlane.xlu1 %341  ;;  %v403_v53 = vmul.f32 %v333_v52, %v1346_v15  ;;  %v390_v50 = vpop.xlane.xlu0 %389 }
 0x108   :  { %v406_v57 = vmul.f32 %v342_v49, %v1346_v15  ;;  %v422_v6 = vmul.f32 %v390_v50, %v1346_v15 }
 0x109   :  { %v1589_v3 = vadd.f32 1e-05, %v403_v53 }
 0x10a   :  { %v1582_v58 = vadd.f32 1e-05, %v406_v57  ;;  %v1584_v36 = vpop.eup %1011  ;;  %v1595_v25 = vadd.f32 1e-05, %v422_v6 }
 0x10b   :  { %v596_v37 = vmul.f32 %v1584_v36, %v1574_v45  ;;  %v1592_v11 = vpop.eup %1013  ;;  %vm602_vm2 = vweird.f32 %v1584_v36  ;;  %vm581_vm10 = vweird.f32 %v1589_v3 }
 0x10c   :  { %1015 = vrsqrt.f32 %v1582_v58  ;;  %v756_v56 = vmul.f32 %v1592_v11, %v1576_v18  ;;  %vm1652_vm6 = vmor %vm601_vm3, %vm602_vm2  ;;  %vm611_vm7 = vweird.f32 %v1582_v58  ;;  %vm762_vm8 = vweird.f32 %v1592_v11 }
 0x10d   :  { %v597_v24 = vmul.f32 %v1584_v36, %v596_v37  ;;  %1017 = vrsqrt.f32 %v1589_v3  ;;  %vm1705_vm12 = vmor %vm761_vm5, %vm762_vm8  ;;  %vm771_vm1 = vweird.f32 %v1595_v25 }
 0x10e   :  { %v384_v54 = vpop.xlane.xlu2 %383  ;;  %1019 = vrsqrt.f32 %v1595_v25  ;;  %v757_v41 = vmul.f32 %v1592_v11, %v756_v56 }
 0x10f   :  { %v381_v16 = vpop.xlane.xlu1 %380  ;;  %v420_v55 = vmul.f32 %v384_v54, %v1346_v15  ;;  %v336_v12 = vpop.xlane.xlu0 %335  ;;  %v598_v30 = vmul.f32 0.5, %v597_v24 }
 0x110   :  { %v419_v17 = vmul.f32 %v381_v16, %v1346_v15  ;;  %v404_v42 = vmul.f32 %v336_v12, %v1346_v15  ;;  %v758_v54 = vmul.f32 0.5, %v757_v41 }
 0x111   :  { %v1603_v29 = vadd.f32 1e-05, %v420_v55  ;;  %v599_v52 = vsub.f32 1.5, %v598_v30 }
 0x112   :  { %v1605_v33 = vadd.f32 1e-05, %v419_v17  ;;  %v1607_v34 = vpop.eup %1015  ;;  %v1610_v0 = vadd.f32 1e-05, %v404_v42 }
 0x113   :  { %v606_v60 = vmul.f32 %v1607_v34, %v1582_v58  ;;  %1021 = vrsqrt.f32 %v1603_v29  ;;  %v1616_v61 = vpop.eup %1017  ;;  %v600_v42 = vmul.f32 %v1584_v36, %v599_v52  ;;  %vm612_vm4 = vweird.f32 %v1607_v34 }
 0x114   :  { %1023 = vrsqrt.f32 %v1605_v33  ;;  %v1623_v24 = vpop.eup %1019  ;;  %v576_v16 = vmul.f32 %v1616_v61, %v1589_v3  ;;  %v759_v52 = vsub.f32 1.5, %v758_v54  ;;  %vm1661_vm9 = vmor %vm611_vm7, %vm612_vm4  ;;  %vm582_vm11 = vweird.f32 %v1616_v61 }
 0x115   :  { %v607_v31 = vmul.f32 %v1607_v34, %v606_v60  ;;  %1025 = vrsqrt.f32 %v1610_v0  ;;  %v604_v58 = vsel %vm1652_vm6, %v1584_v36, %v600_v42  ;;  %vm751_vm13 = vweird.f32 %v1603_v29  ;;  %vm1754_vm5 = vmor %vm581_vm10, %vm582_vm11 }
 0x116   :  { %vm772_vm14 = vweird.f32 %v1623_v24  ;;  %vm741_vm15 = vweird.f32 %v1605_v33  ;;  %vm591_vm3 = vweird.f32 %v1610_v0 }
 0x117   :  { %v330_v49 = vpop.xlane.xlu2 %329  ;;  %v327_v53 = vpop.xlane.xlu1 %326  ;;  %v608_v57 = vmul.f32 0.5, %v607_v31 }
 0x118   :  { %v402_v50 = vmul.f32 %v330_v49, %v1346_v15  ;;  %v401_v6 = vmul.f32 %v327_v53, %v1346_v15  ;;  %v375_v37 = vpop.xlane.xlu0 %374  ;;  %v577_v53 = vmul.f32 %v1616_v61, %v576_v16 }
 0x119   :  { %v1627_v55 = vpop.eup %1021  ;;  %v609_v17 = vsub.f32 1.5, %v608_v57  ;;  %v417_v60 = vmul.f32 %v375_v37, %v1346_v15  ;;  %v766_v57 = vmul.f32 %v1623_v24, %v1595_v25 }
 0x11a   :  { %v1629_v12 = vadd.f32 1e-05, %v402_v50  ;;  %v1631_v56 = vadd.f32 1e-05, %v401_v6  ;;  %v746_v30 = vmul.f32 %v1627_v55, %v1603_v29  ;;  %v1638_v41 = vpop.eup %1023  ;;  %vm752_vm2 = vweird.f32 %v1627_v55 }
 0x11b   :  { %v610_v31 = vmul.f32 %v1607_v34, %v609_v17  ;;  %v1644_v49 = vpop.eup %1025  ;;  %v736_v50 = vmul.f32 %v1638_v41, %v1605_v33  ;;  %v1666_v16 = vadd.f32 1e-05, %v417_v60  ;;  %v578_v60 = vmul.f32 0.5, %v577_v53  ;;  %v1694_v53 = vld [vmem:[#allocation5] ss:$0 sm:$0xff]  ;;  %vm1781_vm7 = vmor %vm751_vm13, %vm752_vm2 }
 0x11c   :  { %1027 = vrsqrt.f32 %v1629_v12  ;;  %v586_v6 = vmul.f32 %v1644_v49, %v1610_v0  ;;  %v747_v54 = vmul.f32 %v1627_v55, %v746_v30  ;;  %v1678_v30 = vmul.f32 %v1592_v11, %v759_v52 }
 0x11d   :  { %1029 = vrsqrt.f32 %v1631_v56  ;;  %v737_v4 = vmul.f32 %v1638_v41, %v736_v50  ;;  %v614_v2 = vsel %vm1661_vm9, %v1607_v34, %v610_v31  ;;  %v767_v22 = vmul.f32 %v1623_v24, %v766_v57 }
 0x11e   :  { %1031 = vrsqrt.f32 %v1666_v16  ;;  %v587_v42 = vmul.f32 %v1644_v49, %v586_v6  ;;  %v748_v37 = vmul.f32 0.5, %v747_v54  ;;  %v789_v31 = vmul.f32 %v604_v58, %v1354_v28 }
 0x11f   :  { %v321_v17 = vpop.xlane.xlu2 %320  ;;  %v378_v43 = vpop.xlane.xlu1 %377  ;;  %v790_v52 = vmul.f32 %v614_v2, %v1372_v51  ;;  %v579_v28 = vsub.f32 1.5, %v578_v60  ;;  %v768_v51 = vmul.f32 0.5, %v767_v22  ;;  %vm742_vm4 = vweird.f32 %v1638_v41 }
 0x120   :  { %v399_v26 = vmul.f32 %v321_v17, %v1346_v15  ;;  %v418_v63 = vmul.f32 %v378_v43, %v1346_v15  ;;  %v324_v48 = vpop.xlane.xlu0 %323  ;;  %v749_v6 = vsub.f32 1.5, %v748_v37  ;;  %v824_v60 = vmul.f32 %v1694_v53, %v789_v31  ;;  %vm1794_vm10 = vmor %vm741_vm15, %vm742_vm4 }
 0x121   :  { %v400_v45 = vmul.f32 %v324_v48, %v1346_v15  ;;  %v1734_v37 = vmul.f32 %v1616_v61, %v579_v28  ;;  %vm571_vm6 = vweird.f32 %v1629_v12  ;;  %vm592_vm8 = vweird.f32 %v1644_v49  ;;  %vm1815_vm15 = vmor %vm771_vm1, %vm772_vm14 }
 0x122   :  { %v1682_v36 = vpop.eup %1027  ;;  %v1685_v50 = vadd.f32 1e-05, %v399_v26  ;;  %v1687_v43 = vadd.f32 1e-05, %v418_v63  ;;  %v738_v63 = vmul.f32 0.5, %v737_v4  ;;  %v588_v4 = vmul.f32 0.5, %v587_v42  ;;  %vm1828_vm4 = vmor %vm591_vm3, %vm592_vm8 }
 0x123   :  { %v566_v34 = vmul.f32 %v1682_v36, %v1629_v12  ;;  %v1696_v57 = vpop.eup %1029  ;;  %v1715_v26 = vadd.f32 1e-05, %v400_v45  ;;  %v825_v42 = vmul.f32 %v1694_v53, %v790_v52  ;;  %v859_v59 = vadd.f32 %v1726_v8, %v824_v60 }
 0x124   :  { %1033 = vrsqrt.f32 %v1685_v50  ;;  %v556_v2 = vmul.f32 %v1696_v57, %v1631_v56  ;;  %v1721_v22 = vpop.eup %1031  ;;  %v739_v45 = vsub.f32 1.5, %v738_v63  ;;  %v589_v63 = vsub.f32 1.5, %v588_v4 }
 0x125   :  { %1035 = vrsqrt.f32 %v1687_v43  ;;  %v567_v54 = vmul.f32 %v1682_v36, %v566_v34  ;;  %v716_v18 = vmul.f32 %v1721_v22, %v1666_v16  ;;  %v769_v34 = vsub.f32 1.5, %v768_v51 }
 0x126   :  { %v557_v1 = vmul.f32 %v1696_v57, %v556_v2  ;;  %1037 = vrsqrt.f32 %v1715_v26  ;;  %v860_v44 = vadd.f32 %v1726_v8, %v825_v42  ;;  %vm561_vm9 = vweird.f32 %v1631_v56 }
 0x127   :  { %v372_v17 = vpop.xlane.xlu2 %371  ;;  %v369_v58 = vpop.xlane.xlu1 %368  ;;  %v568_v38 = vmul.f32 0.5, %v567_v54  ;;  %v717_v28 = vmul.f32 %v1721_v22, %v716_v18  ;;  %v1762_v18 = vmul.f32 %v1638_v41, %v739_v45  ;;  %v770_v45 = vmul.f32 %v1623_v24, %v769_v34 }
 0x128   :  { %v416_v31 = vmul.f32 %v372_v17, %v1346_v15  ;;  %v415_v2 = vmul.f32 %v369_v58, %v1346_v15  ;;  %v1759_v17 = vmul.f32 %v1627_v55, %v749_v6  ;;  %v558_v54 = vmul.f32 0.5, %v557_v1 }
 0x129   :  { %v885_v6 = vpack.c.bf16 %v860_v44, %v859_v59  ;;  %v1799_v44 = vmul.f32 %v1644_v49, %v589_v63  ;;  %v569_v29 = vsub.f32 1.5, %v568_v38  ;;  %vm572_vm11 = vweird.f32 %v1682_v36 }
 0x12a   :  { %v1739_v52 = vpop.eup %1033  ;;  %v1764_v58 = vadd.f32 1e-05, %v416_v31  ;;  %v1788_v31 = vadd.f32 1e-05, %v415_v2  ;;  %v718_v34 = vmul.f32 0.5, %v717_v28  ;;  %v559_v60 = vsub.f32 1.5, %v558_v54 }
 0x12b   :  { %v536_v51 = vmul.f32 %v1739_v52, %v1685_v50  ;;  %v1748_v32 = vpop.eup %1035  ;;  %vm562_vm13 = vweird.f32 %v1696_v57  ;;  %vm721_vm2 = vweird.f32 %v1666_v16  ;;  %v919_v54 = vsel %vm95_vm0, %v885_v6, 0 }
 0x12c   :  { %v726_v42 = vmul.f32 %v1748_v32, %v1687_v43  ;;  %v1774_v19 = vpop.eup %1037  ;;  %1039 = vrsqrt.f32 %v1764_v58  ;;  %945 = vmatpush.bf16.xpose.msra.mxu0 %v919_v54  ;;  %v594_v23 = vsel %vm1828_vm4, %v1644_v49, %v1799_v44  ;;  %v1848_v54 = vmul.f32 %v1682_v36, %v569_v29  ;;  %vm1884_vm3 = vmor %vm561_vm9, %vm562_vm13 }
 0x12d   :  { %v537_v3 = vmul.f32 %v1739_v52, %v536_v51  ;;  %v315_v51 = vpop.xlane.xlu0 %314  ;;  %v546_v2 = vmul.f32 %v1774_v19, %v1715_v26  ;;  %1041 = vrsqrt.f32 %v1788_v31  ;;  %v719_v38 = vsub.f32 1.5, %v718_v34 }
 0x12e   :  { %v727_v28 = vmul.f32 %v1748_v32, %v726_v42  ;;  %v2626_v42 = vsel %vm1705_vm12, %v1592_v11, %v1678_v30  ;;  %v397_v0 = vmul.f32 %v315_v51, %v1346_v15  ;;  %vm541_vm14 = vweird.f32 %v1685_v50  ;;  %vm1868_vm12 = vmor %vm571_vm6, %vm572_vm11 }
 0x12f   :  { %v538_v63 = vmul.f32 0.5, %v537_v3  ;;  %v363_v33 = vpop.xlane.xlu2 %362  ;;  %v774_v3 = vsel %vm1815_vm15, %v1623_v24, %v770_v45  ;;  %v805_v6 = vmul.f32 %v2626_v42, %v1351_v27  ;;  %v318_v39 = vpop.xlane.xlu1 %317  ;;  %v1855_v27 = vmul.f32 %v1696_v57, %v559_v60 }
 0x130   :  { %v806_v24 = vmul.f32 %v774_v3, %v1369_v47  ;;  %v1858_v30 = vadd.f32 1e-05, %v397_v0  ;;  %v413_v45 = vmul.f32 %v363_v33, %v1346_v15  ;;  %v728_v44 = vmul.f32 0.5, %v727_v28 }
 0x131   :  { %v840_v11 = vmul.f32 %v1694_v53, %v805_v6  ;;  %v539_v49 = vsub.f32 1.5, %v538_v63  ;;  %v398_v34 = vmul.f32 %v318_v39, %v1346_v15  ;;  %vm722_vm1 = vweird.f32 %v1721_v22 }
 0x132   :  { %v1852_v48 = vpop.eup %1039  ;;  %v547_v60 = vmul.f32 %v1774_v19, %v546_v2  ;;  %v841_v51 = vmul.f32 %v1694_v53, %v806_v24  ;;  %1043 = vrsqrt.f32 %v1858_v30  ;;  %v574_v39 = vsel %vm1868_vm12, %v1682_v36, %v1848_v54  ;;  %vm1914_vm9 = vmor %vm721_vm2, %vm722_vm1 }
 0x133   :  { %v706_v29 = vmul.f32 %v1852_v48, %v1764_v58  ;;  %v1889_v33 = vmul.f32 %v1721_v22, %v719_v38  ;;  %vm542_vm6 = vweird.f32 %v1739_v52  ;;  %vm731_vm8 = vweird.f32 %v1687_v43  ;;  %v1894_v2 = vpop.eup %1041 }
 0x134   :  { %vm732_vm11 = vweird.f32 %v1748_v32  ;;  %v564_v56 = vsel %vm1884_vm3, %v1696_v57, %v1855_v27  ;;  %v875_v63 = vadd.f32 %v1726_v8, %v840_v11  ;;  %v876_v28 = vadd.f32 %v1726_v8, %v841_v51 }
 0x135   :  { %v1902_v25 = vadd.f32 1e-05, %v413_v45  ;;  %v1905_v3 = vmul.f32 %v1739_v52, %v539_v49  ;;  %v729_v42 = vsub.f32 1.5, %v728_v44  ;;  %v707_v6 = vmul.f32 %v1852_v48, %v706_v29  ;;  %v366_v29 = vpop.xlane.xlu0 %365 }
 0x136   :  { %v1908_v0 = vadd.f32 1e-05, %v398_v34  ;;  %v548_v24 = vmul.f32 0.5, %v547_v60  ;;  %v893_v11 = vpack.c.bf16 %v876_v28, %v875_v63  ;;  %v2633_v45 = vsel %vm1754_vm5, %v1616_v61, %v1734_v37  ;;  %vm1939_vm5 = vmor %vm541_vm14, %vm542_vm6 }
 0x137   :  { %1045 = vrsqrt.f32 %v1902_v25  ;;  %v787_v49 = vmul.f32 %v2633_v45, %v1362_v35  ;;  %vm552_vm13 = vweird.f32 %v1774_v19  ;;  %v696_v44 = vmul.f32 %v1894_v2, %v1788_v31  ;;  %v312_v34 = vpop.xlane.xlu2 %311  ;;  %v309_v45 = vpop.xlane.xlu1 %308 }
 0x138   :  { %1047 = vrsqrt.f32 %v1908_v0  ;;  %v1933_v60 = vpop.eup %1043  ;;  %vm551_vm15 = vweird.f32 %v1715_v26  ;;  %v943_v61 = vsel %vm95_vm0, %v893_v11, 0  ;;  %v788_v37 = vmul.f32 %v594_v23, %v1385_v7 }
 0x139   :  { %v822_v4 = vmul.f32 %v1694_v53, %v787_v49  ;;  %v2636_v51 = vsel %vm1794_vm10, %v1638_v41, %v1762_v18  ;;  %v544_v50 = vsel %vm1939_vm5, %v1739_v52, %v1905_v3  ;;  %v1958_v28 = vmul.f32 %v1748_v32, %v729_v42  ;;  %958 = vmatpush.bf16.xpose.msra.mxu1 %v943_v61  ;;  %vm2016_vm4 = vmor %vm551_vm15, %vm552_vm13 }
 0x13a   :  { %v803_v63 = vmul.f32 %v2636_v51, %v1393_v10  ;;  %v708_v11 = vmul.f32 0.5, %v707_v6  ;;  %v516_v7 = vmul.f32 %v1933_v60, %v1858_v30  ;;  %v549_v23 = vsub.f32 1.5, %v548_v24 }
 0x13b   :  { %v823_v59 = vmul.f32 %v1694_v53, %v788_v37  ;;  %v2637_v10 = vsel %vm1781_vm7, %v1627_v55, %v1759_v17  ;;  %vm711_vm10 = vweird.f32 %v1764_v58  ;;  %vm712_vm2 = vweird.f32 %v1852_v48  ;;  %vm1981_vm7 = vmor %vm731_vm8, %vm732_vm11 }
 0x13c   :  { %v804_v41 = vmul.f32 %v2637_v10, %v1390_v9  ;;  %v838_v18 = vmul.f32 %v1694_v53, %v803_v63  ;;  %v697_v42 = vmul.f32 %v1894_v2, %v696_v44  ;;  %v857_v6 = vadd.f32 %v1726_v8, %v822_v4  ;;  %vm2045_vm8 = vmor %vm711_vm10, %vm712_vm2 }
 0x13d   :  { %v414_v24 = vmul.f32 %v366_v29, %v1346_v15  ;;  %v1975_v49 = vpop.eup %1045  ;;  %v858_v55 = vadd.f32 %v1726_v8, %v823_v59  ;;  %v396_v44 = vmul.f32 %v312_v34, %v1346_v15  ;;  %v709_v43 = vsub.f32 1.5, %v708_v11 }
 0x13e   :  { %v839_v17 = vmul.f32 %v1694_v53, %v804_v41  ;;  %v873_v1 = vadd.f32 %v1726_v8, %v838_v18  ;;  %v1989_v61 = vpop.eup %1047  ;;  %v517_v37 = vmul.f32 %v1933_v60, %v516_v7  ;;  %v676_v4 = vmul.f32 %v1975_v49, %v1902_v25 }
 0x13f   :  { %v1999_v51 = vmul.f32 %v1774_v19, %v549_v23  ;;  %v526_v63 = vmul.f32 %v1989_v61, %v1908_v0  ;;  %v884_v34 = vpack.c.bf16 %v858_v55, %v857_v6  ;;  %v698_v10 = vmul.f32 0.5, %v697_v42  ;;  %v357_v55 = vpop.xlane.xlu0 %356  ;;  %v360_v27 = vpop.xlane.xlu1 %359 }
 0x140   :  { %v874_v59 = vadd.f32 %v1726_v8, %v839_v17  ;;  %v677_v41 = vmul.f32 %v1975_v49, %v676_v4  ;;  %v2005_v18 = vadd.f32 1e-05, %v414_v24  ;;  %v2007_v11 = vadd.f32 1e-05, %v396_v44  ;;  %v303_v17 = vpop.xlane.xlu2 %302 }
 0x141   :  { %v527_v7 = vmul.f32 %v1989_v61, %v526_v63  ;;  %v916_v29 = vsel %vm95_vm0, %v884_v34, 0  ;;  %v395_v23 = vmul.f32 %v309_v45, %v1346_v15  ;;  %v2021_v42 = vmul.f32 %v1852_v48, %v709_v43 }
 0x142   :  { %v892_v16 = vpack.c.bf16 %v874_v59, %v873_v1  ;;  %vm702_vm14 = vweird.f32 %v1894_v2  ;;  %v518_v24 = vmul.f32 0.5, %v517_v37  ;;  %946 = vmatpush.bf16.xpose.msra.mxu0 %v916_v29  ;;  %1049 = vrsqrt.f32 %v2005_v18 }
 0x143   :  { %v554_v26 = vsel %vm2016_vm4, %v1774_v19, %v1999_v51  ;;  %v678_v45 = vmul.f32 0.5, %v677_v41  ;;  %1051 = vrsqrt.f32 %v2007_v11  ;;  %v699_v44 = vsub.f32 1.5, %v698_v10 }
 0x144   :  { %v940_v1 = vsel %vm95_vm0, %v892_v16, 0  ;;  %vm701_vm1 = vweird.f32 %v1788_v31  ;;  %vm522_vm6 = vweird.f32 %v1933_v60  ;;  %v2033_v29 = vadd.f32 1e-05, %v395_v23  ;;  %v2666_v31 = vld [vmem:[#allocation13_spill] sm:$0xff] }
 0x145   :  { %959 = vmatpush.bf16.xpose.msra.mxu1 %v940_v1  ;;  %v785_v19 = vmul.f32 %v564_v56, %v1403_v21  ;;  %vm521_vm11 = vweird.f32 %v1858_v30  ;;  %v528_v43 = vmul.f32 0.5, %v527_v7  ;;  %v786_v12 = vmul.f32 %v574_v39, %v1414_v14  ;;  %vm2113_vm5 = vmor %vm701_vm1, %vm702_vm14 }
 0x146   :  { %v411_v21 = vmul.f32 %v357_v55, %v1346_v15  ;;  %v393_v57 = vmul.f32 %v303_v17, %v1346_v15  ;;  %v714_v58 = vsel %vm2045_vm8, %v1852_v48, %v2021_v42  ;;  %v519_v56 = vsub.f32 1.5, %v518_v24  ;;  %vm2131_vm10 = vmor %vm521_vm11, %vm522_vm6 }
 0x147   :  { %vm681_vm3 = vweird.f32 %v1902_v25  ;;  %1053 = vrsqrt.f32 %v2033_v29  ;;  %v820_v47 = vmul.f32 %v1694_v53, %v785_v19  ;;  %v679_v37 = vsub.f32 1.5, %v678_v45 }
 0x148   :  { %vm531_vm12 = vweird.f32 %v1908_v0  ;;  %v821_v14 = vmul.f32 %v1694_v53, %v786_v12  ;;  %v2067_v36 = vadd.f32 1e-05, %v411_v21  ;;  %v2069_v54 = vadd.f32 1e-05, %v393_v57  ;;  %v2071_v39 = vpop.eup %1049 }
 0x149   :  { %v2074_v4 = vmul.f32 %v1894_v2, %v699_v44  ;;  %v855_v51 = vadd.f32 %v1726_v8, %v820_v47  ;;  %v412_v63 = vmul.f32 %v360_v27, %v1346_v15  ;;  %v783_v34 = vmul.f32 %v544_v50, %v1436_v62  ;;  %v2084_v59 = vpop.eup %1051  ;;  %v306_v47 = vpop.xlane.xlu0 %305 }
 0x14a   :  { %vm682_vm13 = vweird.f32 %v1975_v49  ;;  %v529_v10 = vsub.f32 1.5, %v528_v43  ;;  %v686_v41 = vmul.f32 %v2071_v39, %v2005_v18  ;;  %v856_v7 = vadd.f32 %v1726_v8, %v821_v14 }
 0x14b   :  { %v2091_v23 = vmul.f32 %v1933_v60, %v519_v56  ;;  %vm532_vm15 = vweird.f32 %v1989_v61  ;;  %v506_v35 = vmul.f32 %v2084_v59, %v2007_v11  ;;  %1055 = vrsqrt.f32 %v2067_v36  ;;  %vm2142_vm4 = vmor %vm681_vm3, %vm682_vm13 }
 0x14c   :  { %v2098_v62 = vmul.f32 %v1975_v49, %v679_v37  ;;  %v687_v52 = vmul.f32 %v2071_v39, %v686_v41  ;;  %v883_v3 = vpack.c.bf16 %v856_v7, %v855_v51  ;;  %1057 = vrsqrt.f32 %v2069_v54  ;;  %vm2164_vm14 = vmor %vm531_vm12, %vm532_vm15  ;;  %v354_v51 = vpop.xlane.xlu2 %353 }
 0x14d   :  { %v2102_v50 = vpop.eup %1053  ;;  %v507_v6 = vmul.f32 %v2084_v59, %v506_v35  ;;  %v2105_v24 = vadd.f32 1e-05, %v412_v63  ;;  %v784_v55 = vmul.f32 %v554_v26, %v1433_v20  ;;  %v818_v17 = vmul.f32 %v1694_v53, %v783_v34  ;;  %v351_v63 = vpop.xlane.xlu1 %350 }
 0x14e   :  { %v2118_v1 = vmul.f32 %v1989_v61, %v529_v10  ;;  %v688_v44 = vmul.f32 0.5, %v687_v52  ;;  %v496_v19 = vmul.f32 %v2102_v50, %v2033_v29  ;;  %v913_v43 = vsel %vm95_vm0, %v883_v3, 0 }
 0x14f   :  { %v704_v20 = vsel %vm2113_vm5, %v1894_v2, %v2074_v4  ;;  %vm691_vm2 = vweird.f32 %v2005_v18  ;;  %947 = vmatpush.bf16.xpose.msra.mxu0 %v913_v43  ;;  %1059 = vrsqrt.f32 %v2105_v24  ;;  %v819_v26 = vmul.f32 %v1694_v53, %v784_v55 }
 0x150   :  { %v508_v30 = vmul.f32 0.5, %v507_v6  ;;  %v497_v21 = vmul.f32 %v2102_v50, %v496_v19  ;;  %v853_v57 = vadd.f32 %v1726_v8, %v818_v17  ;;  %v2650_v27 = vsel %vm1914_vm9, %v1721_v22, %v1889_v33 }
 0x151   :  { %v801_v56 = vmul.f32 %v2650_v27, %v1411_v40  ;;  %v2154_v37 = vpop.eup %1055  ;;  %v524_v25 = vsel %vm2131_vm10, %v1933_v60, %v2091_v23  ;;  %v689_v38 = vsub.f32 1.5, %v688_v44  ;;  %v854_v22 = vadd.f32 %v1726_v8, %v819_v26 }
 0x152   :  { %v2653_v40 = vsel %vm1981_vm7, %v1748_v32, %v1958_v28  ;;  %v2175_v34 = vpop.eup %1057  ;;  %v684_v0 = vsel %vm2142_vm4, %v1975_v49, %v2098_v62  ;;  %v534_v10 = vsel %vm2164_vm14, %v1989_v61, %v2118_v1  ;;  %vm511_vm9 = vweird.f32 %v2007_v11 }
 0x153   :  { %v802_v33 = vmul.f32 %v2653_v40, %v1424_v46  ;;  %v498_v9 = vmul.f32 0.5, %v497_v21  ;;  %v656_v46 = vmul.f32 %v2154_v37, %v2067_v36  ;;  %vm692_vm7 = vweird.f32 %v2071_v39 }
 0x154   :  { %v476_v32 = vmul.f32 %v2175_v34, %v2069_v54  ;;  %v882_v28 = vpack.c.bf16 %v854_v22, %v853_v57  ;;  %v394_v41 = vmul.f32 %v306_v47, %v1346_v15  ;;  %v509_v7 = vsub.f32 1.5, %v508_v30  ;;  %vm2216_vm12 = vmor %vm691_vm2, %vm692_vm7 }
 0x155   :  { %vm512_vm1 = vweird.f32 %v2084_v59  ;;  %vm501_vm6 = vweird.f32 %v2033_v29  ;;  %v657_v35 = vmul.f32 %v2154_v37, %v656_v46  ;;  %v836_v52 = vmul.f32 %v1694_v53, %v801_v56  ;;  %v2196_v3 = vpop.eup %1059 }
 0x156   :  { %v2199_v6 = vmul.f32 %v2071_v39, %v689_v38  ;;  %v477_v55 = vmul.f32 %v2175_v34, %v476_v32  ;;  %v910_v17 = vsel %vm95_vm0, %v882_v28, 0  ;;  %v837_v44 = vmul.f32 %v1694_v53, %v802_v33  ;;  %v297_v32 = vpop.xlane.xlu0 %296  ;;  %vm2244_vm15 = vmor %vm511_vm9, %vm512_vm1 }
 0x157   :  { %v499_v19 = vsub.f32 1.5, %v498_v9  ;;  %vm502_vm11 = vweird.f32 %v2102_v50  ;;  %vm662_vm3 = vweird.f32 %v2154_v37  ;;  %v666_v43 = vmul.f32 %v2196_v3, %v2105_v24  ;;  %948 = vmatpush.bf16.xpose.msra.mxu0 %v910_v17 }
 0x158   :  { %v658_v26 = vmul.f32 0.5, %v657_v35  ;;  %v871_v30 = vadd.f32 %v1726_v8, %v836_v52  ;;  %v872_v21 = vadd.f32 %v1726_v8, %v837_v44  ;;  %v2210_v57 = vadd.f32 1e-05, %v394_v41  ;;  %v300_v52 = vpop.xlane.xlu1 %299  ;;  %vm2270_vm5 = vmor %vm501_vm6, %vm502_vm11 }
 0x159   :  { %v2221_v56 = vmul.f32 %v2084_v59, %v509_v7  ;;  %vm661_vm13 = vweird.f32 %v2067_v36  ;;  %v478_v47 = vmul.f32 0.5, %v477_v55  ;;  %v667_v38 = vmul.f32 %v2196_v3, %v666_v43 }
 0x15a   :  { %v410_v22 = vmul.f32 %v354_v51, %v1346_v15  ;;  %v694_v40 = vsel %vm2216_vm12, %v2071_v39, %v2199_v6  ;;  %vm482_vm2 = vweird.f32 %v2175_v34  ;;  %v891_v18 = vpack.c.bf16 %v872_v21, %v871_v30  ;;  %vm2308_vm9 = vmor %vm661_vm13, %vm662_vm3 }
 0x15b   :  { %1061 = vrsqrt.f32 %v2210_v57  ;;  %v2234_v33 = vmul.f32 %v2102_v50, %v499_v19  ;;  %v668_v9 = vmul.f32 0.5, %v667_v38  ;;  %vm671_vm7 = vweird.f32 %v2105_v24 }
 0x15c   :  { %v2237_v46 = vadd.f32 1e-05, %v410_v22  ;;  %v409_v51 = vmul.f32 %v351_v63, %v1346_v15  ;;  %v659_v41 = vsub.f32 1.5, %v658_v26  ;;  %v937_v7 = vsel %vm95_vm0, %v891_v18, 0  ;;  %v345_v63 = vpop.xlane.xlu2 %344 }
 0x15d   :  { %v799_v35 = vmul.f32 %v704_v20, %v1445_v5  ;;  %v800_v11 = vmul.f32 %v714_v58, %v1453_v13  ;;  %v514_v55 = vsel %vm2244_vm15, %v2084_v59, %v2221_v56  ;;  %v479_v17 = vsub.f32 1.5, %v478_v47  ;;  %960 = vmatpush.bf16.xpose.msra.mxu1 %v937_v7 }
 0x15e   :  { %v669_v45 = vsub.f32 1.5, %v668_v9  ;;  %1063 = vrsqrt.f32 %v2237_v46  ;;  %vm672_vm8 = vweird.f32 %v2196_v3  ;;  %v2275_v13 = vadd.f32 1e-05, %v409_v51  ;;  %v2662_v9 = vld [vmem:[#allocation12_spill] sm:$0xff] }
 0x15f   :  { %v834_v48 = vmul.f32 %v1694_v53, %v799_v35  ;;  %v835_v2 = vmul.f32 %v1694_v53, %v800_v11  ;;  %v504_v42 = vsel %vm2270_vm5, %v2102_v50, %v2234_v33  ;;  %v391_v16 = vmul.f32 %v297_v32, %v1346_v15  ;;  %vm2349_vm10 = vmor %vm671_vm7, %vm672_vm8 }
 0x160   :  { %v407_v29 = vmul.f32 %v345_v63, %v1346_v15  ;;  %v392_v58 = vmul.f32 %v300_v52, %v1346_v15  ;;  %v2289_v20 = vmul.f32 %v2154_v37, %v659_v41  ;;  %1065 = vrsqrt.f32 %v2275_v13  ;;  %v2669_v63 = vld [vmem:[#allocation14_spill] sm:$0xff] }
 0x161   :  { %v2286_v4 = vpop.eup %1061  ;;  %v869_v44 = vadd.f32 %v1726_v8, %v834_v48  ;;  %v870_v19 = vadd.f32 %v1726_v8, %v835_v2  ;;  %v2295_v43 = vmul.f32 %v2175_v34, %v479_v17  ;;  %v2298_v26 = vmul.f32 %v2196_v3, %v669_v45  ;;  %v2670_v48 = vld [vmem:[#allocation15_spill] sm:$0xff] }
 0x162   :  { %v486_v30 = vmul.f32 %v2286_v4, %v2210_v57  ;;  %v2302_v21 = vadd.f32 1e-05, %v391_v16  ;;  %v2312_v22 = vadd.f32 1e-05, %v407_v29  ;;  %v2314_v18 = vadd.f32 1e-05, %v392_v58 }
 0x163   :  { %v890_v38 = vpack.c.bf16 %v870_v19, %v869_v44  ;;  %v781_v51 = vmul.f32 %v524_v25, %v2662_v9  ;;  %vm2663_vm1 = vweird.f32 %v2069_v54  ;;  %vm491_vm11 = vweird.f32 %v2210_v57 }
 0x164   :  { %v2322_v32 = vpop.eup %1063  ;;  %vm2328_vm6 = vmor %vm2663_vm1, %vm482_vm2  ;;  %v487_v41 = vmul.f32 %v2286_v4, %v486_v30  ;;  %1067 = vrsqrt.f32 %v2302_v21  ;;  %v782_v60 = vmul.f32 %v534_v10, %v2666_v31  ;;  %v664_v54 = vsel %vm2308_vm9, %v2154_v37, %v2289_v20  ;;  %v2686_v20 = vld [vmem:[#allocation19_spill] sm:$0xff] }
 0x165   :  { %v646_v25 = vmul.f32 %v2322_v32, %v2237_v46  ;;  %v934_v14 = vsel %vm95_vm0, %v890_v38, 0  ;;  %1069 = vrsqrt.f32 %v2312_v22  ;;  %v484_v61 = vsel %vm2328_vm6, %v2175_v34, %v2295_v43 }
 0x166   :  { %v674_v24 = vsel %vm2349_vm10, %v2196_v3, %v2298_v26  ;;  %v488_v1 = vmul.f32 0.5, %v487_v41  ;;  %961 = vmatpush.bf16.xpose.msra.mxu1 %v934_v14  ;;  %1071 = vrsqrt.f32 %v2314_v18  ;;  %v2366_v10 = vpop.eup %1065  ;;  %v816_v35 = vmul.f32 %v1694_v53, %v781_v51  ;;  %v2690_v3 = vld [vmem:[#allocation23_spill] sm:$0xff] }
 0x167   :  { %v647_v7 = vmul.f32 %v2322_v32, %v646_v25  ;;  %v817_v11 = vmul.f32 %v1694_v53, %v782_v60  ;;  %v797_v52 = vmul.f32 %v684_v0, %v2669_v63  ;;  %vm492_vm14 = vweird.f32 %v2286_v4  ;;  %v348_v0 = vpop.xlane.xlu0 %347 }
 0x168   :  { %v489_v17 = vsub.f32 1.5, %v488_v1  ;;  %vm651_vm3 = vweird.f32 %v2237_v46  ;;  %v636_v45 = vmul.f32 %v2366_v10, %v2275_v13  ;;  %v798_v2 = vmul.f32 %v694_v40, %v2670_v48  ;;  %vm2408_vm12 = vmor %vm491_vm11, %vm492_vm14 }
 0x169   :  { %v648_v12 = vmul.f32 0.5, %v647_v7  ;;  %vm652_vm13 = vweird.f32 %v2322_v32  ;;  %v851_v49 = vadd.f32 %v1726_v8, %v816_v35  ;;  %v852_v62 = vadd.f32 %v1726_v8, %v817_v11 }
 0x16a   :  { %v2390_v16 = vpop.eup %1067  ;;  %v490_v29 = vmul.f32 %v2286_v4, %v489_v17  ;;  %v637_v58 = vmul.f32 %v2366_v10, %v636_v45  ;;  %vm641_vm4 = vweird.f32 %v2275_v13  ;;  %vm642_vm2 = vweird.f32 %v2366_v10  ;;  %v2673_v45 = vld [vmem:[#allocation16_spill] sm:$0xff] }
 0x16b   :  { %v832_v39 = vmul.f32 %v1694_v53, %v797_v52  ;;  %v2397_v6 = vpop.eup %1069  ;;  %v649_v27 = vsub.f32 1.5, %v648_v12  ;;  %v456_v40 = vmul.f32 %v2390_v16, %v2302_v21  ;;  %v881_v44 = vpack.c.bf16 %v852_v62, %v851_v49 }
 0x16c   :  { %v833_v19 = vmul.f32 %v1694_v53, %v798_v2  ;;  %v2402_v30 = vpop.eup %1071  ;;  %v638_v9 = vmul.f32 0.5, %v637_v58  ;;  %vm461_vm7 = vweird.f32 %v2302_v21  ;;  %vm462_vm8 = vweird.f32 %v2390_v16  ;;  %v2680_v58 = vld [vmem:[#allocation21_spill] sm:$0xff] }
 0x16d   :  { %v616_v51 = vmul.f32 %v2397_v6, %v2312_v22  ;;  %v408_v41 = vmul.f32 %v348_v0, %v1346_v15  ;;  %v494_v31 = vsel %vm2408_vm12, %v2286_v4, %v490_v29  ;;  %v650_v57 = vmul.f32 %v2322_v32, %v649_v27  ;;  %vm2445_vm12 = vmor %vm651_vm3, %vm652_vm13  ;;  %v2676_v0 = vld [vmem:[#allocation18_spill] sm:$0xff]  ;;  %v2679_v29 = vld [vmem:[#allocation20_spill] sm:$0xff] }
 0x16e   :  { %v457_v60 = vmul.f32 %v2390_v16, %v456_v40  ;;  %v466_v25 = vmul.f32 %v2402_v30, %v2314_v18  ;;  %vm471_vm1 = vweird.f32 %v2314_v18  ;;  %v639_v14 = vsub.f32 1.5, %v638_v9  ;;  %vm2464_vm3 = vmor %vm641_vm4, %vm642_vm2 }
 0x16f   :  { %v617_v1 = vmul.f32 %v2397_v6, %v616_v51  ;;  %v907_v7 = vsel %vm95_vm0, %v881_v44, 0  ;;  %v867_v15 = vadd.f32 %v1726_v8, %v832_v39  ;;  %vm621_vm11 = vweird.f32 %v2312_v22  ;;  %vm2486_vm15 = vmor %vm461_vm7, %vm462_vm8  ;;  %v2683_v44 = vld [vmem:[#allocation17_spill] sm:$0xff] }
 0x170   :  { %v458_v35 = vmul.f32 0.5, %v457_v60  ;;  %vm622_vm14 = vweird.f32 %v2397_v6  ;;  %v467_v4 = vmul.f32 %v2402_v30, %v466_v25  ;;  %949 = vmatpush.bf16.xpose.msra.mxu0 %v907_v7  ;;  %v868_v11 = vadd.f32 %v1726_v8, %v833_v19 }
 0x171   :  { %v640_v63 = vmul.f32 %v2366_v10, %v639_v14  ;;  %v618_v52 = vmul.f32 0.5, %v617_v1  ;;  %v2433_v17 = vadd.f32 1e-05, %v408_v41  ;;  %v779_v48 = vmul.f32 %v504_v42, %v2673_v45  ;;  %vm2528_vm9 = vmor %vm621_vm11, %vm622_vm14 }
 0x172   :  { %v459_v12 = vsub.f32 1.5, %v458_v35  ;;  %v468_v49 = vmul.f32 0.5, %v467_v4  ;;  %v889_v62 = vpack.c.bf16 %v868_v11, %v867_v15  ;;  %v780_v5 = vmul.f32 %v514_v55, %v2676_v0  ;;  %v2691_v15 = vld [vmem:[#allocation24_spill] sm:$0xff]  ;;  %v2692_v4 = vld [vmem:[#allocation26_spill] sm:$0xff] }
 0x173   :  { %v654_v50 = vsel %vm2445_vm12, %v2322_v32, %v650_v57  ;;  %v619_v33 = vsub.f32 1.5, %v618_v52  ;;  %vm472_vm5 = vweird.f32 %v2402_v30  ;;  %1073 = vrsqrt.f32 %v2433_v17 }
 0x174   :  { %v460_v59 = vmul.f32 %v2390_v16, %v459_v12  ;;  %v469_v56 = vsub.f32 1.5, %v468_v49  ;;  %v931_v28 = vsel %vm95_vm0, %v889_v62, 0  ;;  %v814_v55 = vmul.f32 %v1694_v53, %v779_v48  ;;  %vm2506_vm6 = vmor %vm471_vm1, %vm472_vm5  ;;  %v2693_v49 = vld [vmem:[#allocation25_spill] sm:$0xff] }
 0x175   :  { %v644_v42 = vsel %vm2464_vm3, %v2366_v10, %v640_v63  ;;  %962 = vmatpush.bf16.xpose.msra.mxu1 %v931_v28  ;;  %v815_v32 = vmul.f32 %v1694_v53, %v780_v5  ;;  %v777_v13 = vmul.f32 %v484_v61, %v2679_v29  ;;  %v778_v39 = vmul.f32 %v494_v31, %v2680_v58 }
 0x176   :  { %v620_v10 = vmul.f32 %v2397_v6, %v619_v33  ;;  %v470_v40 = vmul.f32 %v2402_v30, %v469_v56  ;;  %v849_v36 = vadd.f32 %v1726_v8, %v814_v55  ;;  %v795_v34 = vmul.f32 %v664_v54, %v2683_v44 }
 0x177   :  { %v464_v43 = vsel %vm2486_vm15, %v2390_v16, %v460_v59  ;;  %v850_v61 = vadd.f32 %v1726_v8, %v815_v32  ;;  %v812_v47 = vmul.f32 %v1694_v53, %v777_v13  ;;  %v813_v19 = vmul.f32 %v1694_v53, %v778_v39  ;;  %v2687_v16 = vld [vmem:[#allocation22_spill] sm:$0xff]  ;;  %v2694_v32 = vld [vmem:[#allocation27_spill] sm:$0xff] }
 0x178   :  { %v474_v37 = vsel %vm2506_vm6, %v2402_v30, %v470_v40  ;;  %v796_v18 = vmul.f32 %v674_v24, %v2686_v20  ;;  %v830_v54 = vmul.f32 %v1694_v53, %v795_v34  ;;  %v793_v38 = vmul.f32 %v644_v42, %v2687_v16 }
 0x179   :  { %v1074_v9 = vpop.eup %1073  ;;  %v880_v30 = vpack.c.bf16 %v850_v61, %v849_v36  ;;  %v847_v23 = vadd.f32 %v1726_v8, %v812_v47  ;;  %v848_v41 = vadd.f32 %v1726_v8, %v813_v19  ;;  %v794_v26 = vmul.f32 %v654_v50, %v2690_v3  ;;  %v877_v36 = vld [vmem:[%s2576_s3] sm:$0x3] }
 0x17a   :  { %v624_v24 = vsel %vm2528_vm9, %v2397_v6, %v620_v10  ;;  %v626_v31 = vmul.f32 %v1074_v9, %v2433_v17  ;;  %v831_v57 = vmul.f32 %v1694_v53, %v796_v18  ;;  %v865_v60 = vadd.f32 %v1726_v8, %v830_v54 }
 0x17b   :  { %v904_v22 = vsel %vm95_vm0, %v880_v30, 0  ;;  %v828_v25 = vmul.f32 %v1694_v53, %v793_v38  ;;  %v829_v14 = vmul.f32 %v1694_v53, %v794_v26  ;;  %v775_v35 = vmul.f32 %v464_v43, %v2691_v15 }
 0x17c   :  { %v627_v1 = vmul.f32 %v1074_v9, %v626_v31  ;;  %950 = vmatpush.bf16.xpose.msra.mxu0 %v904_v22  ;;  %v866_v7 = vadd.f32 %v1726_v8, %v831_v57  ;;  %v776_v6 = vmul.f32 %v474_v37, %v2692_v4  ;;  %v879_v11 = vpack.c.bf16 %v848_v41, %v847_v23 }
 0x17d   :  { %v863_v63 = vadd.f32 %v1726_v8, %v828_v25  ;;  %v864_v48 = vadd.f32 %v1726_v8, %v829_v14  ;;  %v810_v12 = vmul.f32 %v1694_v53, %v775_v35  ;;  %v791_v62 = vmul.f32 %v624_v24, %v2693_v49 }
 0x17e   :  { %v628_v52 = vmul.f32 0.5, %v627_v1  ;;  %v888_v45 = vpack.c.bf16 %v866_v7, %v865_v60  ;;  %v811_v2 = vmul.f32 %v1694_v53, %v776_v6  ;;  %vm632_vm10 = vweird.f32 %v1074_v9 }
 0x17f   :  { %v901_v50 = vsel %vm95_vm0, %v879_v11, 0  ;;  %vm631_vm13 = vweird.f32 %v2433_v17  ;;  %v887_v59 = vpack.c.bf16 %v864_v48, %v863_v63  ;;  %v845_v56 = vadd.f32 %v1726_v8, %v810_v12 }
 0x180   :  { %v629_v0 = vsub.f32 1.5, %v628_v52  ;;  %v928_v5 = vsel %vm95_vm0, %v888_v45, 0  ;;  %v846_v33 = vadd.f32 %v1726_v8, %v811_v2  ;;  %vm633_vm4 = vmor %vm631_vm13, %vm632_vm10  ;;  %v826_v28 = vmul.f32 %v1694_v53, %v791_v62 }
 0x181   :  { %963 = vmatpush.bf16.xpose.msra.mxu1 %v928_v5  ;;  %v925_v13 = vsel %vm95_vm0, %v887_v59, 0  ;;  %vm974_vm2 = vcmask 1041408  }
 0x182   :  { %v630_v46 = vmul.f32 %v1074_v9, %v629_v0  ;;  %v878_v42 = vpack.c.bf16 %v846_v33, %v845_v56  ;;  %v861_v39 = vadd.f32 %v1726_v8, %v826_v28 }
 0x184   :  { %v634_v55 = vsel %vm633_vm4, %v1074_v9, %v630_v46  ;;  %951 = vmatpush.bf16.xpose.msra.mxu0 %v901_v50  ;;  %v898_v17 = vsel %vm95_vm0, %v878_v42, 0 }
 0x185   :  { %v792_v29 = vmul.f32 %v634_v55, %v2694_v32 }
 0x187   :  { %v827_v58 = vmul.f32 %v1694_v53, %v792_v29 }
 0x189   :  { %964 = vmatpush.bf16.xpose.msra.mxu1 %v925_v13  ;;  %v862_v27 = vadd.f32 %v1726_v8, %v827_v58 }
 0x18b   :  { %v886_v10 = vpack.c.bf16 %v862_v27, %v861_v39 }
 0x18c   :  { %952 = vmatpush.bf16.xpose.msra.mxu0 %v898_v17 }
 0x18d   :  { %v922_v40 = vsel %vm95_vm0, %v886_v10, 0 }
 0x191   :  { %965 = vmatpush.bf16.xpose.msra.mxu1 %v922_v40 }
 0x193   :  { %998 = vmatmul.msk.bf16.vlgmr.msra.gmra.mxu0 %vm95_vm0, %v877_v36 }
 0x198   :  { %999 = vmatmul.msk.bf16.vlgmr.msra.gmra.mxu1 %vm95_vm0, %v877_v36 }
 0x210   :  { %v954_v53 = vpop.f32.mrf.mxu0 }
 0x215   :  { %v967_v44 = vpop.f32.mrf.mxu1 }
 0x216   :  { %v971_v34 = vpack.c.bf16 %v967_v44, %v954_v53 }
 0x218   :  { %v973_v8 = vrot.slane %v971_v34, 2  ;;  %v956_v43 = vpop.f32.mrf.mxu0 }
 0x21a   :  { %v977_v21 = vsel %vm974_vm2, %v971_v34, %v973_v8 }
 0x21b   :  { %979 = vst [vmem:[#allocation8] sm:$0xf] %v977_v21 }
 0x21c   :  { %990 = dma.vmem_to_hbm [thread:$0]  %s986_s6, 64, %s988_s9, [#allocation4]  }
 0x21d   :  { %v969_v61 = vpop.f32.mrf.mxu1 }
 0x21e   :  { %1175 = dma.done.wait [#allocation4], 64  }
 0x21f   :  { %1176 = vsyncadd [#allocation4], 4294967232 }
 0x220   :  { %995 = vsyncpa [#allocation3], 1 }
 0x221   :  { %996 = vsyncpa [#allocation6], 1 }
 0x222   :  { %997 = vsyncpa [#allocation4], 1 }

</bundles_post_ra>
